<compile_context>
chip_gen: v7x
topology: tpu7x:2x2x1
jax: 0.10.0
libtpu: 0.0.40
codegen_flags: <defaults>
</compile_context>

<pallas_src>
import functools

import jax
import jax.numpy as jnp
from jax.experimental import pallas as pl
from jax.experimental.pallas import tpu as pltpu


def _round_up(x, m):
    return ((x + m - 1) // m) * m


def _cdiv(a, b):
    return (a + b - 1) // b


# ----------------------------- Pallas kernel -------------------------------

def _matmul_kernel(a_ref, b_ref, o_ref):
    # bf16 x bf16 -> f32 accumulation on the MXU.  Full-K tiles (K = 320),
    # so no accumulator grid axis is needed.
    o_ref[...] = jnp.dot(a_ref[...], b_ref[...],
                         preferred_element_type=jnp.float32)


# ------------------------- one-time weight prep -----------------------------

def prepare_fc_softmax_weight(kernel, *, target_tile_n=4096,
                              dtype=jnp.bfloat16):
    """One-time (init-time) transform of the (E, classnum) weight.

    Returns (weight_tiles, tn) where weight_tiles has shape (gn, E, tn):
      * padded along the class axis to gn * tn (tn a multiple of 128, chosen
        so the padding is < 128 columns),
      * cast to `dtype` (bf16 by default: half the HBM weight stream, MXU
        native on v5e/v6e/v7x),
      * tile-contiguous: weight_tiles[g] holds classes [g*tn, (g+1)*tn) as one
        contiguous HBM slab -> each grid step's weight DMA is contiguous.
    """
    K, N = kernel.shape
    gn = max(1, _cdiv(N, target_tile_n))
    tn = _round_up(_cdiv(N, gn), 128)
    Np = gn * tn
    w = jnp.pad(kernel, ((0, 0), (0, Np - N))).astype(dtype)
    # (K, Np) -> (gn, K, tn); tile g = original columns [g*tn, (g+1)*tn).
    w = jnp.transpose(w.reshape(K, gn, tn), (1, 0, 2))
    return w, tn


# ------------------------------- forward -----------------------------------

@functools.partial(jax.jit, static_argnames=("n_classes",))
def fc_softmax_forward(embeddings, weight_tiles, *, n_classes):
    """embeddings (B, E) @ pre-laid-out weight tiles (gn, E, tn) -> (B, n_classes) f32."""
    B, K = embeddings.shape
    gn, K2, tn = weight_tiles.shape
    assert K == K2, (K, K2)

    # Pad batch to a multiple of 16 sublane-rows (bf16 packing), cast to the
    # weight dtype.  This per-call cost is tiny (B x 320 elements).
    tm = min(256, _round_up(max(B, 1), 16))
    Mp = _round_up(B, tm)
    a = jnp.pad(embeddings, ((0, Mp - B), (0, 0))).astype(weight_tiles.dtype)

    out = pl.pallas_call(
        _matmul_kernel,
        out_shape=jax.ShapeDtypeStruct((Mp, gn * tn), jnp.float32),
        grid_spec=pltpu.PrefetchScalarGridSpec(
            num_scalar_prefetch=0,
            grid=(Mp // tm, gn),
            in_specs=[
                # Activations: (tm, K) tile, reused across the N axis.
                pl.BlockSpec((tm, K), lambda i, j: (i, 0)),
                # Weights: one contiguous (K, tn) slab per N tile; the leading
                # tile axis is squeezed so the kernel sees a 2-D (K, tn) ref.
                pl.BlockSpec((pl.Squeezed(), K, tn), lambda i, j: (j, 0, 0)),
            ],
            out_specs=pl.BlockSpec((tm, tn), lambda i, j: (i, j)),
        ),
        compiler_params=pltpu.CompilerParams(
            dimension_semantics=("parallel", "parallel")),
    )(a, weight_tiles)

    return out[:B, :n_classes]


# --------------------------------- demo ------------------------------------

if __name__ == "__main__":
    key = jax.random.PRNGKey(0)
    k_emb, k_w = jax.random.split(key)

    # Shapes consistent with the module: embedding_size=320; classnum kept
    # small for the demo (module default is 51332) and chosen NOT to be a
    # multiple of the tile width so the pad / multi-tile / slice path runs.
    B, E, C = 2, 320, 4100
    embeddings = jax.random.normal(k_emb, (B, E), jnp.float32)
    fc_kernel = jax.random.normal(k_w, (E, C), jnp.float32) * 0.01  # init.normal_(std=0.01)

    # One-time parameter preparation (would normally live at module init).
    w_tiles, tile_n = prepare_fc_softmax_weight(fc_kernel)
    w_tiles = jax.block_until_ready(w_tiles)

    out = fc_softmax_forward(embeddings, w_tiles, n_classes=C)
    out = jax.block_until_ready(out)

    assert out.shape == (B, C), out.shape
    assert bool(jnp.all(jnp.isfinite(out)))

    # Validate against the plain f32 reference (loose tolerance: bf16
    # operands, f32 accumulation).
    ref = embeddings @ fc_kernel
    rel_err = jnp.max(jnp.abs(out - ref)) / (jnp.max(jnp.abs(ref)) + 1e-6)
    assert float(rel_err) < 2e-2, float(rel_err)

    print("KERNEL_OK")
</pallas_src>

<mosaic_0001>
module attributes {stable_mosaic.version = 11 : i64} {
  func.func @_matmul_kernel(%arg0: i32, %arg1: i32, %arg2: memref<16x320xbf16, #tpu.memory_space<vmem>>, %arg3: memref<1x320x2176xbf16, #tpu.memory_space<vmem>>, %arg4: memref<16x2176xf32, #tpu.memory_space<vmem>>) attributes {dimension_semantics = [#tpu.dimension_semantics<parallel>, #tpu.dimension_semantics<parallel>], iteration_bounds = array<i64: 1, 2>, scalar_prefetch = 0 : i64, scratch_operands = 0 : i64, tpu.core_type = #tpu.core_type<tc>, window_params = [{transform_indices = @transform_0, window_bounds = array<i64: 16, 320>}, {transform_indices = @transform_1, window_bounds = array<i64: 1, 320, 2176>}, {transform_indices = @transform_2, window_bounds = array<i64: 16, 2176>}]} {
    %c0 = arith.constant 0 : index
    %c0_0 = arith.constant 0 : index
    %0 = vector.load %arg2[%c0, %c0_0] : memref<16x320xbf16, #tpu.memory_space<vmem>>, vector<16x320xbf16>
    %c0_1 = arith.constant 0 : index
    %c0_2 = arith.constant 0 : index
    %c0_3 = arith.constant 0 : index
    %1 = vector.load %arg3[%c0_1, %c0_2, %c0_3] : memref<1x320x2176xbf16, #tpu.memory_space<vmem>>, vector<1x320x2176xbf16>
    %2 = vector.shape_cast %1 : vector<1x320x2176xbf16> to vector<320x2176xbf16>
    %cst = arith.constant dense<0.000000e+00> : vector<16x2176xf32>
    %3 = tpu.matmul %0, %2, %cst {dimension_numbers = #tpu.dot_dimension_numbers<[1], [0], [0], [1], [0, 0, 1, 1], [], []>} : vector<16x320xbf16>, vector<320x2176xbf16>, vector<16x2176xf32> -> vector<16x2176xf32>
    %c0_4 = arith.constant 0 : index
    %c0_5 = arith.constant 0 : index
    %4 = vector.load %arg4[%c0_4, %c0_5] : memref<16x2176xf32, #tpu.memory_space<vmem>>, vector<16x2176xf32>
    tpu.vector_store %arg4[%c0_4, %c0_5], %3 {strides = array<i32>} : memref<16x2176xf32, #tpu.memory_space<vmem>>, vector<16x2176xf32>,
    return
  }
  func.func @transform_0(%arg0: i32, %arg1: i32) -> (i32, i32) {
    %c0_i32 = arith.constant 0 : i32
    %c0_i32_0 = arith.constant 0 : i32
    return %arg0, %c0_i32 : i32, i32
  }
  func.func @transform_1(%arg0: i32, %arg1: i32) -> (i32, i32, i32) {
    %c0_i32 = arith.constant 0 : i32
    %c0_i32_0 = arith.constant 0 : i32
    %c0_i32_1 = arith.constant 0 : i32
    return %arg1, %c0_i32, %c0_i32_0 : i32, i32, i32
  }
  func.func @transform_2(%arg0: i32, %arg1: i32) -> (i32, i32) {
    %c0_i32 = arith.constant 0 : i32
    return %arg0, %arg1 : i32, i32
  }
}

</mosaic_0001>

<bundles_post_ra>
// kernel: fc_softmax_forward.1
= control target key start
LH: loop header
LB: loop body
LE: loop exit
PB: predicated region body
PF: predicated region fallthrough
CT: control target
= control target key end

     0   :  { %7 = vsyncpa [#allocation3], 0  ;;  %s5055_s0 = inlined_call_operand.vmem [shape: bf16[16,320], index: 0, kind: input, shape index: {}]   ;;  %s5056_s1 = inlined_call_operand.hbm [shape: bf16[2,320,2176], index: 1, kind: input, shape index: {}]   ;;  %s5057_s2 = inlined_call_operand.vmem [shape: f32[16,4352], index: 2, kind: output, shape index: {}]  }
   0x1   :  { %9 = vsyncpa [#allocation3 + $0x1], 0  ;;  %s4399_s9 = smov 0   ;;  %s4401_s10 = smov 0  }
   0x2   :  { %s4403_s11 = smov 0   ;;  %s4405_s12 = smov 0  }
   0x3   :  { %s4407_s13 = smov 0   ;;  %s4409_s14 = smov 0  }
   0x4 LB: > { %s3291_s15 = sadd.s32 4294967295, %s4376_s14   ;;  %s24_s16 = sadd.s32 1, %s4372_s13  ;;  %s4376_s14 = sphi %s4409_s14, %s15_s14   ;;  %s4372_s13 = sphi %s4407_s13, %s5067_s13   ;;  %s4368_s12 = sphi %s4405_s12, %s5066_s12   ;;  %s4364_s11 = sphi %s4403_s11, %s5065_s11   ;;  %s4360_s10 = sphi %s4401_s10, %s5064_s10   ;;  %s4356_s9 = sphi %s4399_s9, %s5063_s9  }
   0x5   : > { %p25_p0 = scmp.ge.s32.totalorder %s24_s16, 2  ;;  %s60_s17 = sadd.s32 1, %s4364_s11 }
   0x6   : > { %p67_p1 = scmp.ne.s32.totalorder %s4364_s11, %s4360_s10  ;;  %p68_p2 = scmp.eq.s32.totalorder %s4376_s14, 0 }
   0x7   : > { %s5069_s16 = smov (%p25_p0, %s24_s16), 0  ;;  %p73_p4 = scmp.ne.s32.totalorder %s4360_s10, %s4356_s9 }
   0x8   : > { %p4435_p3 = por %p68_p2, %p67_p1  ;;  %s57_s19 = ssub.s32 %s4372_s13, %s5069_s16 }
   0x9   : > { %p74_p5 = scmp.eq.s32.totalorder %s3291_s15, 0  ;;  %p58_p6 = scmp.eq.s32.totalorder %s57_s19, 0 }
   0xa   : > { %p99_p7 = scmp.eq.s32.totalorder %s3291_s15, 1  ;;  %p3735_p10 = scmp.lt.s32.totalorder %s4376_s14, 2 }
   0xb   : > { %p4442_p8 = por %p74_p5, %p73_p4  ;;  %s135_s23 = sand.u32 1, %s4364_s11  }
   0xc   : > { %s4447_s21 = scalar_select %p58_p6, %s4364_s11, %s60_s17  }
   0xd   : > { %p4449_p9 = por %p99_p7, %p67_p1  ;;  %s3726_s24 = smul.u32 43520, %s4372_s13 }
   0xe   : > { %s3725_s25 = smul.u32 2720, %s135_s23  ;;  %p4463_p11 = pnand %p3735_p10, %p4435_p3 }
   0xf   : > { %s5060_s22 = scalar_select %p4449_p9, 1, 0 }
  0x10   : > { %s4459_s28 = scalar_lea.hbm %s5056_s1, %s3726_s24  ;;  %s139_s30 = scalar_lea.vmem [#allocation2], %s3725_s25 }
  0x11   : > { %s146_s3 = sshll.u32 %s139_s30, 4  ;;  %s4469_s4 = scalar_lea.sflag [#allocation3], %s135_s23  ;;  %s4467_s3 = int_to_ptr.vmem [resolvable:$true] %s146_s3 }
  0x12   : > { %s4296_s5 = scalar_lea.hbm %s4459_s28, 43520  ;;  %p4298_p13 = pneg %p4463_p11 }
  0x13   : > { %p4297_p12 = scmp.ne.s32.totalorder %s4459_s28, %s4296_s5  ;;  %s4301_s8 = scalar_lea.hbm %s5056_s1, 87040 }
  0x14   : > { %p4302_p2 = scmp.lt.u32.totalorder %s4459_s28, %s5056_s1  ;;  %p4303_p3 = scmp.lt.u32.totalorder %s4301_s8, %s4296_s5 }
  0x15   : > { %p4299_p0 = pnand %p4298_p13, %p4297_p12  ;;  %p4305_p5 = scmp.lt.u32.totalorder %s4296_s5, %s4459_s28 }
  0x16   : > { %p4304_p4 = por %p4303_p3, %p4302_p2 }
  0x17   : > { %p4300_p1 = pneg %p4299_p0 }
  0x18   : > { %p4306_p6 = por %p4305_p5, %p4304_p4 }
  0x1a   : > { %p4307_p7 = pnand %p4306_p6, %p4300_p1 }
  0x1c   : > { %4310 = shalt.err (!%p4307_p7)
}
  0x1d   : > { %s4311_s17 = scalar_lea.vmem %s4467_s3, 43520  ;;  %s4378_s18 = smov [#allocation2]  }
  0x1e   : > { %p4312_p10 = scmp.ne.s32.totalorder %s4467_s3, %s4311_s17  ;;  %s4316_s19 = sshll.u32 %s4378_s18, 4  ;;  %s4317_s19 = int_to_ptr.vmem [resolvable:$false] %s4316_s19 }
  0x1f   : > { %s4318_s23 = scalar_lea.vmem %s4317_s19, 87040  ;;  %p4319_p9 = scmp.lt.s32.totalorder %s4467_s3, %s4317_s19 }
  0x20   : > { %p4314_p12 = pnand %p4312_p10, %p4298_p13  ;;  %p4320_p2 = scmp.lt.s32.totalorder %s4318_s23, %s4311_s17 }
  0x22   : > { %p4315_p0 = pneg %p4314_p12  ;;  %p4321_p3 = por %p4320_p2, %p4319_p9 }
  0x24   : > { %p4322_p4 = pnand %p4321_p3, %p4315_p0 }
  0x26   : > { %4325 = shalt.err (!%p4322_p4)
}
  0x27   : > { %s4379_s24 = smov 1088   ;;  %s4380_s25 = smov 68  }
  0x28   : > { %3734 = dma.hbm_to_vmem [thread:$0]  (!%p4463_p11), %s4459_s28, 43520, %s4467_s3, %s4469_s4, %s4379_s24, %s4379_s24, %s4380_s25  }
  0x29   : > { %p3297_p13 = scmp.ge.s32.totalorder %s4376_s14, 1  ;;  %p154_p1 = scmp.lt.s32.totalorder %s4376_s14, 3 }
  0x2b   : > { %p155_p5 = pnand %p3297_p13, %p154_p1 }
  0x2c   : > { %s4500_s26 = sand.u32 (!%p155_p5), 1, %s4360_s10  }
  0x2d   : > { %158 = sbr.rel (%p155_p5) target bundleno = 634 (0x27a), region = 28  ;;  %s161_s30 = scalar_lea.sflag (!%p155_p5), [#allocation3], %s4500_s26 }
  0x2e   : > { %s3727_s27 = smul.u32 (!%p155_p5), 2720, %s4500_s26 }
  0x30   : > { %s4504_s5 = scalar_lea.vmem (!%p155_p5), [#allocation2], %s3727_s27 }
  0x34   : > { %4351 = dma.done.wait (%p4442_p8), %s161_s30, 43520  }
  0x35   : > { %4353 = vsyncadd (%p4442_p8), %s161_s30, 4294923776  ;;  %v3789_v0 = vld [vmem:[%s4504_s5 + $0x4] ss:$68 sps:$4 sm:$0xff]   ;;  %v3792_v2 = vld [vmem:[%s4504_s5 + $0xc] ss:$68 sps:$4 sm:$0xff]   ;;  %vm2299_vm0 = vcmask 523264  }
  0x36   : > { %v3791_v1 = vld [vmem:[%s4504_s5] ss:$68 sps:$4 sm:$0xff]   ;;  %2303 = vmatprep.subr.bf16.mxu0 %v3789_v0  ;;  %v3794_v3 = vld [vmem:[%s4504_s5 + $0x8] ss:$68 sps:$4 sm:$0xff]   ;;  %2389 = vmatprep.subr.bf16.mxu1 %v3792_v2  ;;  %v3798_v6 = vld [vmem:[%s4504_s5 + $0x94] ss:$68 sps:$4 sm:$0xff]  }
  0x37   : > { %2304 = vmatpush1.bf16.msra.mxu0 %v3791_v1  ;;  %v3795_v4 = vld [vmem:[%s4504_s5 + $0x8c] ss:$68 sps:$4 sm:$0xff]   ;;  %2390 = vmatpush1.bf16.msra.mxu1 %v3794_v3  ;;  %v3801_v8 = vld [vmem:[%s4504_s5 + $0x114] ss:$68 sps:$4 sm:$0xff]   ;;  %v3804_v10 = vld [vmem:[%s4504_s5 + $0x11c] ss:$68 sps:$4 sm:$0xff]  }
  0x38   : > { %v3797_v5 = vld [vmem:[%s4504_s5 + $0x88] ss:$68 sps:$4 sm:$0xff]   ;;  %2305 = vmatprep.subr.bf16.mxu0 %v3795_v4  ;;  %v3800_v7 = vld [vmem:[%s4504_s5 + $0x90] ss:$68 sps:$4 sm:$0xff]   ;;  %2391 = vmatprep.subr.bf16.mxu1 %v3798_v6  ;;  %v3807_v11 = vld [vmem:[%s4504_s5 + $0x19c] ss:$68 sps:$4 sm:$0xff]  }
  0x39   : > { %v3803_v9 = vld [vmem:[%s4504_s5 + $0x110] ss:$68 sps:$4 sm:$0xff]   ;;  %v3806_v12 = vld [vmem:[%s4504_s5 + $0x118] ss:$68 sps:$4 sm:$0xff]   ;;  %v3810_v13 = vld [vmem:[%s4504_s5 + $0x1a4] ss:$68 sps:$4 sm:$0xff]  }
  0x3a   : > { %v3809_v14 = vld [vmem:[%s4504_s5 + $0x198] ss:$68 sps:$4 sm:$0xff]   ;;  %v3813_v15 = vld [vmem:[%s4504_s5 + $0x224] ss:$68 sps:$4 sm:$0xff]   ;;  %v3816_v17 = vld [vmem:[%s4504_s5 + $0x22c] ss:$68 sps:$4 sm:$0xff]  }
  0x3b   : > { %2306 = vmatpush1.bf16.msra.mxu0 %v3797_v5  ;;  %2392 = vmatpush1.bf16.msra.mxu1 %v3800_v7  ;;  %v3812_v16 = vld [vmem:[%s4504_s5 + $0x1a0] ss:$68 sps:$4 sm:$0xff]   ;;  %v3819_v19 = vld [vmem:[%s4504_s5 + $0x2ac] ss:$68 sps:$4 sm:$0xff]   ;;  %v3822_v21 = vld [vmem:[%s4504_s5 + $0x2b4] ss:$68 sps:$4 sm:$0xff]  }
  0x3c   : > { %2307 = vmatprep.subr.bf16.mxu0 %v3801_v8  ;;  %2393 = vmatprep.subr.bf16.mxu1 %v3804_v10  ;;  %v3815_v18 = vld [vmem:[%s4504_s5 + $0x220] ss:$68 sps:$4 sm:$0xff]   ;;  %v3818_v20 = vld [vmem:[%s4504_s5 + $0x228] ss:$68 sps:$4 sm:$0xff]   ;;  %v3825_v23 = vld [vmem:[%s4504_s5 + $0x334] ss:$68 sps:$4 sm:$0xff]  }
  0x3d   : > { %v3821_v22 = vld [vmem:[%s4504_s5 + $0x2a8] ss:$68 sps:$4 sm:$0xff]   ;;  %v3824_v24 = vld [vmem:[%s4504_s5 + $0x2b0] ss:$68 sps:$4 sm:$0xff]   ;;  %v3828_v25 = vld [vmem:[%s4504_s5 + $0x33c] ss:$68 sps:$4 sm:$0xff]  }
  0x3e   : > { %v3827_v26 = vld [vmem:[%s4504_s5 + $0x330] ss:$68 sps:$4 sm:$0xff]   ;;  %v3831_v27 = vld [vmem:[%s4504_s5 + $0x3bc] ss:$68 sps:$4 sm:$0xff]   ;;  %v3834_v29 = vld [vmem:[%s4504_s5 + $0x3c4] ss:$68 sps:$4 sm:$0xff]  }
  0x3f   : > { %2308 = vmatpush1.bf16.msra.mxu0 %v3803_v9  ;;  %2394 = vmatpush1.bf16.msra.mxu1 %v3806_v12  ;;  %v3830_v28 = vld [vmem:[%s4504_s5 + $0x338] ss:$68 sps:$4 sm:$0xff]   ;;  %v3837_v31 = vld [vmem:[%s4504_s5 + $0x444] ss:$68 sps:$4 sm:$0xff]   ;;  %v3840_v33 = vld [vmem:[%s4504_s5 + $0x44c] ss:$68 sps:$4 sm:$0xff]  }
  0x40   : > { %2309 = vmatprep.subr.bf16.mxu0 %v3807_v11  ;;  %2395 = vmatprep.subr.bf16.mxu1 %v3810_v13  ;;  %v3833_v30 = vld [vmem:[%s4504_s5 + $0x3b8] ss:$68 sps:$4 sm:$0xff]   ;;  %v3836_v32 = vld [vmem:[%s4504_s5 + $0x3c0] ss:$68 sps:$4 sm:$0xff]   ;;  %v3843_v35 = vld [vmem:[%s4504_s5 + $0x4cc] ss:$68 sps:$4 sm:$0xff]  }
  0x41   : > { %v3839_v34 = vld [vmem:[%s4504_s5 + $0x440] ss:$68 sps:$4 sm:$0xff]   ;;  %v3842_v36 = vld [vmem:[%s4504_s5 + $0x448] ss:$68 sps:$4 sm:$0xff]   ;;  %v3846_v37 = vld [vmem:[%s4504_s5 + $0x4d4] ss:$68 sps:$4 sm:$0xff]  }
  0x42   : > { %v3845_v38 = vld [vmem:[%s4504_s5 + $0x4c8] ss:$68 sps:$4 sm:$0xff]   ;;  %v3849_v39 = vld [vmem:[%s4504_s5 + $0x554] ss:$68 sps:$4 sm:$0xff]   ;;  %v3852_v41 = vld [vmem:[%s4504_s5 + $0x55c] ss:$68 sps:$4 sm:$0xff]  }
  0x43   : > { %2310 = vmatpush1.bf16.msra.mxu0 %v3809_v14  ;;  %2396 = vmatpush1.bf16.msra.mxu1 %v3812_v16  ;;  %v3848_v40 = vld [vmem:[%s4504_s5 + $0x4d0] ss:$68 sps:$4 sm:$0xff]   ;;  %v3855_v43 = vld [vmem:[%s4504_s5 + $0x5dc] ss:$68 sps:$4 sm:$0xff]   ;;  %v3858_v46 = vld [vmem:[%s4504_s5 + $0x5e4] ss:$68 sps:$4 sm:$0xff]  }
  0x44   : > { %2311 = vmatprep.subr.bf16.mxu0 %v3813_v15  ;;  %2397 = vmatprep.subr.bf16.mxu1 %v3816_v17  ;;  %v3851_v42 = vld [vmem:[%s4504_s5 + $0x550] ss:$68 sps:$4 sm:$0xff]   ;;  %v3854_v44 = vld [vmem:[%s4504_s5 + $0x558] ss:$68 sps:$4 sm:$0xff]   ;;  %v3861_v48 = vld [vmem:[%s4504_s5 + $0x664] ss:$68 sps:$4 sm:$0xff]  }
  0x45   : > { %v3857_v45 = vld [vmem:[%s4504_s5 + $0x5d8] ss:$68 sps:$4 sm:$0xff]   ;;  %v4560_v47 = vld [vmem:[%s5055_s0 + $0x4] ss:$12 sps:$4 sm:$0xff]   ;;  %v3866_v53 = vld [vmem:[%s4504_s5 + $0x668] ss:$68 sps:$4 sm:$0xff]  }
  0x46   : > { %v3860_v49 = vld [vmem:[%s4504_s5 + $0x5e0] ss:$68 sps:$4 sm:$0xff]   ;;  %2335 = vmatprep.mubr.bf16.mxu0 %v4560_v47  ;;  %v3864_v50 = vld [vmem:[%s4504_s5 + $0x66c] ss:$68 sps:$4 sm:$0xff]   ;;  %2421 = vmatprep.mubr.bf16.mxu1 %v4560_v47  ;;  %v3870_v54 = vld [vmem:[%s4504_s5 + $0x6f4] ss:$68 sps:$4 sm:$0xff]  }
  0x47   : > { %2312 = vmatpush1.bf16.msra.mxu0 %v3815_v18  ;;  %2398 = vmatpush1.bf16.msra.mxu1 %v3818_v20  ;;  %v3863_v51 = vld [vmem:[%s4504_s5 + $0x660] ss:$68 sps:$4 sm:$0xff]   ;;  %v3867_v52 = vld [vmem:[%s4504_s5 + $0x6ec] ss:$68 sps:$4 sm:$0xff]   ;;  %v3873_v56 = vld [vmem:[%s4504_s5 + $0x774] ss:$68 sps:$4 sm:$0xff]  }
  0x48   : > { %2313 = vmatprep.subr.bf16.mxu0 %v3819_v19  ;;  %2399 = vmatprep.subr.bf16.mxu1 %v3822_v21  ;;  %v3869_v55 = vld [vmem:[%s4504_s5 + $0x6e8] ss:$68 sps:$4 sm:$0xff]   ;;  %v3872_v57 = vld [vmem:[%s4504_s5 + $0x6f0] ss:$68 sps:$4 sm:$0xff]   ;;  %v3876_v58 = vld [vmem:[%s4504_s5 + $0x77c] ss:$68 sps:$4 sm:$0xff]  }
  0x49   : > { %v3875_v59 = vld [vmem:[%s4504_s5 + $0x770] ss:$68 sps:$4 sm:$0xff]   ;;  %v3879_v60 = vld [vmem:[%s4504_s5 + $0x7fc] ss:$68 sps:$4 sm:$0xff]   ;;  %v3882_v62 = vld [vmem:[%s4504_s5 + $0x804] ss:$68 sps:$4 sm:$0xff]  }
  0x4a   : > { %v3878_v61 = vld [vmem:[%s4504_s5 + $0x778] ss:$68 sps:$4 sm:$0xff]   ;;  %v3884_v0 = vld [vmem:[%s4504_s5 + $0x800] ss:$68 sps:$4 sm:$0xff]   ;;  %v3893_v3 = vld [vmem:[%s4504_s5 + $0x88c] ss:$68 sps:$4 sm:$0xff]  }
  0x4b   : > { %2314 = vmatpush1.bf16.msra.mxu0 %v3821_v22  ;;  %2400 = vmatpush1.bf16.msra.mxu1 %v3824_v24  ;;  %v3881_v63 = vld [vmem:[%s4504_s5 + $0x7f8] ss:$68 sps:$4 sm:$0xff]   ;;  %v3889_v1 = vld [vmem:[%s4504_s5 + $0x884] ss:$68 sps:$4 sm:$0xff]   ;;  %v4585_v2 = vld [vmem:[%s5055_s0] ss:$12 sps:$4 sm:$0xff]  }
  0x4c   : > { %2315 = vmatprep.subr.bf16.mxu0 %v3825_v23  ;;  %2401 = vmatprep.subr.bf16.mxu1 %v3828_v25  ;;  %v3887_v4 = vld [vmem:[%s4504_s5 + $0x880] ss:$68 sps:$4 sm:$0xff]   ;;  %v3896_v5 = vld [vmem:[%s4504_s5 + $0x90c] ss:$68 sps:$4 sm:$0xff]   ;;  %v3899_v7 = vld [vmem:[%s4504_s5 + $0x914] ss:$68 sps:$4 sm:$0xff]  }
  0x4d   : > { %v3891_v6 = vld [vmem:[%s4504_s5 + $0x888] ss:$68 sps:$4 sm:$0xff]   ;;  %v4381_v9 = vmov 0   ;;  %v3902_v10 = vld [vmem:[%s4504_s5 + $0x994] ss:$68 sps:$4 sm:$0xff]   ;;  %s3728_s19 = smul.u32 272, %s4500_s26 }
  0x4e   : > { %v3894_v8 = vld [vmem:[%s4504_s5 + $0x908] ss:$68 sps:$4 sm:$0xff]   ;;  %v3897_v11 = vld [vmem:[%s4504_s5 + $0x910] ss:$68 sps:$4 sm:$0xff]   ;;  %v3905_v12 = vld [vmem:[%s4504_s5 + $0x99c] ss:$68 sps:$4 sm:$0xff]  }
  0x4f   : > { %2316 = vmatpush1.bf16.msra.mxu0 %v3827_v26  ;;  %2402 = vmatpush1.bf16.msra.mxu1 %v3830_v28  ;;  %v3900_v13 = vld [vmem:[%s4504_s5 + $0x990] ss:$68 sps:$4 sm:$0xff]   ;;  %v3908_v14 = vld [vmem:[%s4504_s5 + $0xa1c] ss:$68 sps:$4 sm:$0xff]   ;;  %v3911_v16 = vld [vmem:[%s4504_s5 + $0xa24] ss:$68 sps:$4 sm:$0xff]  }
  0x50   : > { %2317 = vmatprep.subr.bf16.mxu0 %v3831_v27  ;;  %2403 = vmatprep.subr.bf16.mxu1 %v3834_v29  ;;  %v3903_v15 = vld [vmem:[%s4504_s5 + $0x998] ss:$68 sps:$4 sm:$0xff]   ;;  %v3909_v18 = vld [vmem:[%s4504_s5 + $0xa20] ss:$68 sps:$4 sm:$0xff]   ;;  %v4610_v20 = vld [vmem:[%s5055_s0 + $0x8] ss:$12 sps:$4 sm:$0xff]  }
  0x51   : > { %v3906_v17 = vld [vmem:[%s4504_s5 + $0xa18] ss:$68 sps:$4 sm:$0xff]   ;;  %v3913_v22 = vld [vmem:[%s4504_s5 + $0x10] ss:$68 sps:$4 sm:$0xff]   ;;  %v3924_v25 = vld [vmem:[%s4504_s5 + $0xa4] ss:$68 sps:$4 sm:$0xff]  }
  0x52   : > { %v3915_v19 = vld [vmem:[%s4504_s5 + $0x14] ss:$68 sps:$4 sm:$0xff]   ;;  %v3918_v21 = vld [vmem:[%s4504_s5 + $0x1c] ss:$68 sps:$4 sm:$0xff]   ;;  %v3927_v27 = vld [vmem:[%s4504_s5 + $0x124] ss:$68 sps:$4 sm:$0xff]  }
  0x53   : > { %2318 = vmatpush1.bf16.msra.mxu0 %v3833_v30  ;;  %2404 = vmatpush1.bf16.msra.mxu1 %v3836_v32  ;;  %v3921_v23 = vld [vmem:[%s4504_s5 + $0x9c] ss:$68 sps:$4 sm:$0xff]   ;;  %v3930_v29 = vld [vmem:[%s4504_s5 + $0x12c] ss:$68 sps:$4 sm:$0xff]   ;;  %s4870_s23 = scalar_lea.vmem [#allocation4], %s3728_s19  ;;  %vm4383_vm1 = vmmov 0  }
  0x54   : > { %2319 = vmatprep.subr.bf16.mxu0 %v3837_v31  ;;  %2405 = vmatprep.subr.bf16.mxu1 %v3840_v33  ;;  %v3916_v24 = vld [vmem:[%s4504_s5 + $0x18] ss:$68 sps:$4 sm:$0xff]   ;;  %v3922_v28 = vld [vmem:[%s4504_s5 + $0xa0] ss:$68 sps:$4 sm:$0xff]   ;;  %v3933_v31 = vld [vmem:[%s4504_s5 + $0x1ac] ss:$68 sps:$4 sm:$0xff]  }
  0x55   : > { %v3919_v26 = vld [vmem:[%s4504_s5 + $0x98] ss:$68 sps:$4 sm:$0xff]   ;;  %v3925_v30 = vld [vmem:[%s4504_s5 + $0x120] ss:$68 sps:$4 sm:$0xff]   ;;  %v3928_v32 = vld [vmem:[%s4504_s5 + $0x128] ss:$68 sps:$4 sm:$0xff]  }
  0x56   : > { %v3936_v33 = vld [vmem:[%s4504_s5 + $0x1b4] ss:$68 sps:$4 sm:$0xff]   ;;  %p5062_p8 = scmp.ne.s32.totalorder %s5060_s22, 0 }
  0x57   : > { %2320 = vmatpush1.bf16.msra.mxu0 %v3839_v34  ;;  %2406 = vmatpush1.bf16.msra.mxu1 %v3842_v36  ;;  %v3931_v34 = vld [vmem:[%s4504_s5 + $0x1a8] ss:$68 sps:$4 sm:$0xff]   ;;  %v3934_v36 = vld [vmem:[%s4504_s5 + $0x1b0] ss:$68 sps:$4 sm:$0xff]   ;;  %s3653_s24 = smul.u32 (%p5062_p8), 136, %s4368_s12 }
  0x58   : > { %2321 = vmatprep.subr.bf16.mxu0 %v3843_v35  ;;  %2407 = vmatprep.subr.bf16.mxu1 %v3846_v37  ;;  %v3939_v35 = vld [vmem:[%s4504_s5 + $0x234] ss:$68 sps:$4 sm:$0xff]   ;;  %v3942_v37 = vld [vmem:[%s4504_s5 + $0x23c] ss:$68 sps:$4 sm:$0xff]  }
  0x59   : > { %s4973_s26 = scalar_lea.vmem (%p5062_p8), %s5057_s2, %s3653_s24 }
  0x5b   : > { %2322 = vmatpush1.bf16.msra.mxu0 %v3845_v38  ;;  %2408 = vmatpush1.bf16.msra.mxu1 %v3848_v40  ;;  %v3937_v38 = vld [vmem:[%s4504_s5 + $0x230] ss:$68 sps:$4 sm:$0xff]   ;;  %v3940_v40 = vld [vmem:[%s4504_s5 + $0x238] ss:$68 sps:$4 sm:$0xff]  }
  0x5c   : > { %2323 = vmatprep.subr.bf16.mxu0 %v3849_v39  ;;  %2409 = vmatprep.subr.bf16.mxu1 %v3852_v41  ;;  %v3945_v39 = vld [vmem:[%s4504_s5 + $0x2bc] ss:$68 sps:$4 sm:$0xff]   ;;  %v3948_v41 = vld [vmem:[%s4504_s5 + $0x2c4] ss:$68 sps:$4 sm:$0xff]  }
  0x5f   : > { %2324 = vmatpush1.bf16.msra.mxu0 %v3851_v42  ;;  %2410 = vmatpush1.bf16.msra.mxu1 %v3854_v44  ;;  %v3943_v42 = vld [vmem:[%s4504_s5 + $0x2b8] ss:$68 sps:$4 sm:$0xff]   ;;  %v3946_v44 = vld [vmem:[%s4504_s5 + $0x2c0] ss:$68 sps:$4 sm:$0xff]  }
  0x60   : > { %2325 = vmatprep.subr.bf16.mxu0 %v3855_v43  ;;  %2411 = vmatprep.subr.bf16.mxu1 %v3858_v46  ;;  %v3951_v43 = vld [vmem:[%s4504_s5 + $0x344] ss:$68 sps:$4 sm:$0xff]  }
  0x61   : > { %v3949_v46 = vld [vmem:[%s4504_s5 + $0x340] ss:$68 sps:$4 sm:$0xff]  }
  0x63   : > { %2326 = vmatpush1.bf16.msra.mxu0 %v3857_v45  ;;  %2412 = vmatpush1.bf16.msra.mxu1 %v3860_v49  ;;  %v3954_v45 = vld [vmem:[%s4504_s5 + $0x34c] ss:$68 sps:$4 sm:$0xff]  }
  0x64   : > { %2327 = vmatprep.subr.bf16.mxu0 %v3861_v48  ;;  %2413 = vmatprep.subr.bf16.mxu1 %v3864_v50  ;;  %v3957_v48 = vld [vmem:[%s4504_s5 + $0x3cc] ss:$68 sps:$4 sm:$0xff]   ;;  %v3960_v50 = vld [vmem:[%s4504_s5 + $0x3d4] ss:$68 sps:$4 sm:$0xff]  }
  0x65   : > { %v3952_v49 = vld [vmem:[%s4504_s5 + $0x348] ss:$68 sps:$4 sm:$0xff]  }
  0x67   : > { %2328 = vmatpush1.bf16.msra.mxu0 %v3863_v51  ;;  %2414 = vmatpush1.bf16.msra.mxu1 %v3866_v53  ;;  %v3955_v51 = vld [vmem:[%s4504_s5 + $0x3c8] ss:$68 sps:$4 sm:$0xff]   ;;  %v3958_v53 = vld [vmem:[%s4504_s5 + $0x3d0] ss:$68 sps:$4 sm:$0xff]  }
  0x68   : > { %2329 = vmatprep.subr.bf16.mxu0 %v3867_v52  ;;  %2415 = vmatprep.subr.bf16.mxu1 %v3870_v54  ;;  %v3963_v52 = vld [vmem:[%s4504_s5 + $0x454] ss:$68 sps:$4 sm:$0xff]   ;;  %v3966_v54 = vld [vmem:[%s4504_s5 + $0x45c] ss:$68 sps:$4 sm:$0xff]  }
  0x6b   : > { %2330 = vmatpush1.bf16.msra.mxu0 %v3869_v55  ;;  %2416 = vmatpush1.bf16.msra.mxu1 %v3872_v57  ;;  %v3961_v55 = vld [vmem:[%s4504_s5 + $0x450] ss:$68 sps:$4 sm:$0xff]   ;;  %v3964_v57 = vld [vmem:[%s4504_s5 + $0x458] ss:$68 sps:$4 sm:$0xff]  }
  0x6c   : > { %2331 = vmatprep.subr.bf16.mxu0 %v3873_v56  ;;  %2417 = vmatprep.subr.bf16.mxu1 %v3876_v58  ;;  %v3969_v56 = vld [vmem:[%s4504_s5 + $0x4dc] ss:$68 sps:$4 sm:$0xff]   ;;  %v3972_v58 = vld [vmem:[%s4504_s5 + $0x4e4] ss:$68 sps:$4 sm:$0xff]  }
  0x6f   : > { %2332 = vmatpush1.bf16.msra.mxu0 %v3875_v59  ;;  %2418 = vmatpush1.bf16.msra.mxu1 %v3878_v61  ;;  %v3967_v59 = vld [vmem:[%s4504_s5 + $0x4d8] ss:$68 sps:$4 sm:$0xff]   ;;  %v3970_v61 = vld [vmem:[%s4504_s5 + $0x4e0] ss:$68 sps:$4 sm:$0xff]  }
  0x70   : > { %2333 = vmatprep.subr.bf16.mxu0 %v3879_v60  ;;  %2419 = vmatprep.subr.bf16.mxu1 %v3882_v62  ;;  %v3975_v60 = vld [vmem:[%s4504_s5 + $0x564] ss:$68 sps:$4 sm:$0xff]   ;;  %v3978_v62 = vld [vmem:[%s4504_s5 + $0x56c] ss:$68 sps:$4 sm:$0xff]  }
  0x73   : > { %2334 = vmatpush1.bf16.msra.mxu0 %v3881_v63  ;;  %2420 = vmatpush1.bf16.msra.mxu1 %v3884_v0  ;;  %v3973_v63 = vld [vmem:[%s4504_s5 + $0x560] ss:$68 sps:$4 sm:$0xff]   ;;  %v3981_v0 = vld [vmem:[%s4504_s5 + $0x5ec] ss:$68 sps:$4 sm:$0xff]  }
  0x74   : > { %2346 = vmatprep.subr.bf16.mxu0 %v3889_v1  ;;  %2432 = vmatprep.subr.bf16.mxu1 %v3893_v3  ;;  %v3976_v1 = vld [vmem:[%s4504_s5 + $0x568] ss:$68 sps:$4 sm:$0xff]   ;;  %v3984_v3 = vld [vmem:[%s4504_s5 + $0x5f4] ss:$68 sps:$4 sm:$0xff]  }
  0x76   : > { %2336 = vmatmul.mubr.bf16.vlgmr.msra.gmra.mrb[0].mxu0 %v4585_v2  ;;  %2422 = vmatmul.mubr.bf16.vlgmr.msra.gmra.mrb[0].mxu1 %v4585_v2 }
  0x77   : > { %2347 = vmatpush1.bf16.msra.mxu0 %v3887_v4  ;;  %2378 = vmatprep.mubr.bf16.mxu0 %v4381_v9  ;;  %v3979_v4 = vld [vmem:[%s4504_s5 + $0x5e8] ss:$68 sps:$4 sm:$0xff]  }
  0x78   : > { %2348 = vmatprep.subr.bf16.mxu0 %v3896_v5  ;;  %2433 = vmatpush1.bf16.msra.mxu1 %v3891_v6  ;;  %v3987_v5 = vld [vmem:[%s4504_s5 + $0x674] ss:$68 sps:$4 sm:$0xff]  }
  0x79   : > { %2464 = vmatprep.mubr.bf16.mxu1 %v4381_v9  ;;  %2434 = vmatprep.subr.bf16.mxu1 %v3899_v7  ;;  %v3982_v6 = vld [vmem:[%s4504_s5 + $0x5f0] ss:$68 sps:$4 sm:$0xff]   ;;  %v3990_v7 = vld [vmem:[%s4504_s5 + $0x67c] ss:$68 sps:$4 sm:$0xff]  }
  0x7b   : > { %2349 = vmatpush1.bf16.msra.mxu0 %v3894_v8  ;;  %v3985_v8 = vld [vmem:[%s4504_s5 + $0x670] ss:$68 sps:$4 sm:$0xff]  }
  0x7c   : > { %2350 = vmatprep.subr.bf16.mxu0 %v3902_v10  ;;  %2435 = vmatpush1.bf16.msra.mxu1 %v3897_v11  ;;  %v3993_v10 = vld [vmem:[%s4504_s5 + $0x6fc] ss:$68 sps:$4 sm:$0xff]  }
  0x7d   : > { %2436 = vmatprep.subr.bf16.mxu1 %v3905_v12  ;;  %v3988_v11 = vld [vmem:[%s4504_s5 + $0x678] ss:$68 sps:$4 sm:$0xff]   ;;  %v3996_v12 = vld [vmem:[%s4504_s5 + $0x704] ss:$68 sps:$4 sm:$0xff]  }
  0x7f   : > { %2351 = vmatpush1.bf16.msra.mxu0 %v3900_v13  ;;  %v3991_v13 = vld [vmem:[%s4504_s5 + $0x6f8] ss:$68 sps:$4 sm:$0xff]  }
  0x80   : > { %2352 = vmatprep.subr.bf16.mxu0 %v3908_v14  ;;  %2437 = vmatpush1.bf16.msra.mxu1 %v3903_v15  ;;  %v3999_v14 = vld [vmem:[%s4504_s5 + $0x784] ss:$68 sps:$4 sm:$0xff]  }
  0x81   : > { %2438 = vmatprep.subr.bf16.mxu1 %v3911_v16  ;;  %v3994_v15 = vld [vmem:[%s4504_s5 + $0x700] ss:$68 sps:$4 sm:$0xff]   ;;  %v4002_v16 = vld [vmem:[%s4504_s5 + $0x78c] ss:$68 sps:$4 sm:$0xff]  }
  0x83   : > { %2353 = vmatpush1.bf16.msra.mxu0 %v3906_v17  ;;  %v3997_v17 = vld [vmem:[%s4504_s5 + $0x780] ss:$68 sps:$4 sm:$0xff]  }
  0x84   : > { %2475 = vmatprep.subr.bf16.mxu0 %v3915_v19  ;;  %2439 = vmatpush1.bf16.msra.mxu1 %v3909_v18  ;;  %v4005_v18 = vld [vmem:[%s4504_s5 + $0x80c] ss:$68 sps:$4 sm:$0xff]  }
  0x85   : > { %2561 = vmatprep.subr.bf16.mxu1 %v3918_v21  ;;  %v4000_v19 = vld [vmem:[%s4504_s5 + $0x788] ss:$68 sps:$4 sm:$0xff]   ;;  %v4008_v21 = vld [vmem:[%s4504_s5 + $0x814] ss:$68 sps:$4 sm:$0xff]  }
  0x86   : > { %3641 = vmatmul.mubr.msk.bf16.vlgmr.msra.gmra.mrb[0].mxu0 %vm2299_vm0, %v4610_v20 }
  0x87   : > { %2476 = vmatpush1.bf16.msra.mxu0 %v3913_v22  ;;  %2507 = vmatprep.mubr.bf16.mxu0 %v4560_v47  ;;  %v4003_v22 = vld [vmem:[%s4504_s5 + $0x808] ss:$68 sps:$4 sm:$0xff]  }
  0x88   : > { %3642 = vmatmul.mubr.msk.bf16.vlgmr.msra.gmra.mrb[0].mxu1 %vm2299_vm0, %v4610_v20  ;;  %2477 = vmatprep.subr.bf16.mxu0 %v3921_v23  ;;  %v4011_v23 = vld [vmem:[%s4504_s5 + $0x894] ss:$68 sps:$4 sm:$0xff]  }
  0x89   : > { %2562 = vmatpush1.bf16.msra.mxu1 %v3916_v24  ;;  %2593 = vmatprep.mubr.bf16.mxu1 %v4560_v47  ;;  %v4006_v24 = vld [vmem:[%s4504_s5 + $0x810] ss:$68 sps:$4 sm:$0xff]  }
  0x8a   : > { %2563 = vmatprep.subr.bf16.mxu1 %v3924_v25  ;;  %v4014_v25 = vld [vmem:[%s4504_s5 + $0x89c] ss:$68 sps:$4 sm:$0xff]  }
  0x8b   : > { %2478 = vmatpush1.bf16.msra.mxu0 %v3919_v26  ;;  %v4009_v26 = vld [vmem:[%s4504_s5 + $0x890] ss:$68 sps:$4 sm:$0xff]  }
  0x8c   : > { %2479 = vmatprep.subr.bf16.mxu0 %v3927_v27  ;;  %v4017_v27 = vld [vmem:[%s4504_s5 + $0x91c] ss:$68 sps:$4 sm:$0xff]  }
  0x8d   : > { %2564 = vmatpush1.bf16.msra.mxu1 %v3922_v28  ;;  %v4012_v28 = vld [vmem:[%s4504_s5 + $0x898] ss:$68 sps:$4 sm:$0xff]  }
  0x8e   : > { %2565 = vmatprep.subr.bf16.mxu1 %v3930_v29  ;;  %v4020_v29 = vld [vmem:[%s4504_s5 + $0x924] ss:$68 sps:$4 sm:$0xff]  }
  0x8f   : > { %2480 = vmatpush1.bf16.msra.mxu0 %v3925_v30  ;;  %v4015_v30 = vld [vmem:[%s4504_s5 + $0x918] ss:$68 sps:$4 sm:$0xff]  }
  0x90   : > { %2481 = vmatprep.subr.bf16.mxu0 %v3933_v31  ;;  %v4023_v31 = vld [vmem:[%s4504_s5 + $0x9a4] ss:$68 sps:$4 sm:$0xff]  }
  0x91   : > { %2566 = vmatpush1.bf16.msra.mxu1 %v3928_v32  ;;  %v4018_v32 = vld [vmem:[%s4504_s5 + $0x920] ss:$68 sps:$4 sm:$0xff]  }
  0x92   : > { %2567 = vmatprep.subr.bf16.mxu1 %v3936_v33  ;;  %v4026_v33 = vld [vmem:[%s4504_s5 + $0x9ac] ss:$68 sps:$4 sm:$0xff]  }
  0x93   : > { %2482 = vmatpush1.bf16.msra.mxu0 %v3931_v34  ;;  %v4021_v34 = vld [vmem:[%s4504_s5 + $0x9a0] ss:$68 sps:$4 sm:$0xff]  }
  0x94   : > { %2483 = vmatprep.subr.bf16.mxu0 %v3939_v35  ;;  %v4029_v35 = vld [vmem:[%s4504_s5 + $0xa2c] ss:$68 sps:$4 sm:$0xff]  }
  0x95   : > { %2568 = vmatpush1.bf16.msra.mxu1 %v3934_v36  ;;  %v4032_v36 = vld [vmem:[%s4504_s5 + $0xa34] ss:$68 sps:$4 sm:$0xff]  }
  0x96   : > { %2569 = vmatprep.subr.bf16.mxu1 %v3942_v37  ;;  %v4027_v37 = vld [vmem:[%s4504_s5 + $0xa28] ss:$68 sps:$4 sm:$0xff]  }
  0x97   : > { %2484 = vmatpush1.bf16.msra.mxu0 %v3937_v38  ;;  %v4035_v38 = vld [vmem:[%s4504_s5 + $0x24] ss:$68 sps:$4 sm:$0xff]  }
  0x98   : > { %2485 = vmatprep.subr.bf16.mxu0 %v3945_v39  ;;  %v4030_v39 = vld [vmem:[%s4504_s5 + $0xa30] ss:$68 sps:$4 sm:$0xff]  }
  0x99   : > { %2570 = vmatpush1.bf16.msra.mxu1 %v3940_v40  ;;  %v4038_v40 = vld [vmem:[%s4504_s5 + $0x2c] ss:$68 sps:$4 sm:$0xff]  }
  0x9a   : > { %2571 = vmatprep.subr.bf16.mxu1 %v3948_v41  ;;  %v4033_v41 = vld [vmem:[%s4504_s5 + $0x20] ss:$68 sps:$4 sm:$0xff]  }
  0x9b   : > { %2486 = vmatpush1.bf16.msra.mxu0 %v3943_v42  ;;  %v4041_v42 = vld [vmem:[%s4504_s5 + $0xac] ss:$68 sps:$4 sm:$0xff]  }
  0x9c   : > { %2487 = vmatprep.subr.bf16.mxu0 %v3951_v43  ;;  %v4036_v43 = vld [vmem:[%s4504_s5 + $0x28] ss:$68 sps:$4 sm:$0xff]  }
  0x9d   : > { %2572 = vmatpush1.bf16.msra.mxu1 %v3946_v44  ;;  %v4044_v44 = vld [vmem:[%s4504_s5 + $0xb4] ss:$68 sps:$4 sm:$0xff]  }
  0x9e   : > { %2573 = vmatprep.subr.bf16.mxu1 %v3954_v45  ;;  %v4039_v45 = vld [vmem:[%s4504_s5 + $0xa8] ss:$68 sps:$4 sm:$0xff]  }
  0x9f   : > { %2488 = vmatpush1.bf16.msra.mxu0 %v3949_v46  ;;  %v4047_v46 = vld [vmem:[%s4504_s5 + $0x134] ss:$68 sps:$4 sm:$0xff]  }
  0xa0   : > { %2489 = vmatprep.subr.bf16.mxu0 %v3957_v48  ;;  %v4042_v48 = vld [vmem:[%s4504_s5 + $0xb0] ss:$68 sps:$4 sm:$0xff]  }
  0xa1   : > { %2574 = vmatpush1.bf16.msra.mxu1 %v3952_v49  ;;  %v4050_v49 = vld [vmem:[%s4504_s5 + $0x13c] ss:$68 sps:$4 sm:$0xff]  }
  0xa2   : > { %2575 = vmatprep.subr.bf16.mxu1 %v3960_v50  ;;  %v4045_v50 = vld [vmem:[%s4504_s5 + $0x130] ss:$68 sps:$4 sm:$0xff]  }
  0xa3   : > { %2490 = vmatpush1.bf16.msra.mxu0 %v3955_v51  ;;  %v4053_v51 = vld [vmem:[%s4504_s5 + $0x1bc] ss:$68 sps:$4 sm:$0xff]  }
  0xa4   : > { %2491 = vmatprep.subr.bf16.mxu0 %v3963_v52  ;;  %v4056_v52 = vld [vmem:[%s4504_s5 + $0x1c4] ss:$68 sps:$4 sm:$0xff]  }
  0xa5   : > { %2576 = vmatpush1.bf16.msra.mxu1 %v3958_v53  ;;  %v4051_v53 = vld [vmem:[%s4504_s5 + $0x1b8] ss:$68 sps:$4 sm:$0xff]  }
  0xa6   : > { %2577 = vmatprep.subr.bf16.mxu1 %v3966_v54  ;;  %v4054_v54 = vld [vmem:[%s4504_s5 + $0x1c0] ss:$68 sps:$4 sm:$0xff]  }
  0xa7   : > { %2492 = vmatpush1.bf16.msra.mxu0 %v3961_v55  ;;  %v4062_v55 = vld [vmem:[%s4504_s5 + $0x24c] ss:$68 sps:$4 sm:$0xff]  }
  0xa8   : > { %2493 = vmatprep.subr.bf16.mxu0 %v3969_v56  ;;  %v4057_v56 = vld [vmem:[%s4504_s5 + $0x240] ss:$68 sps:$4 sm:$0xff]  }
  0xa9   : > { %2578 = vmatpush1.bf16.msra.mxu1 %v3964_v57  ;;  %v4065_v57 = vld [vmem:[%s4504_s5 + $0x2cc] ss:$68 sps:$4 sm:$0xff]  }
  0xaa   : > { %2579 = vmatprep.subr.bf16.mxu1 %v3972_v58  ;;  %v4060_v58 = vld [vmem:[%s4504_s5 + $0x248] ss:$68 sps:$4 sm:$0xff]  }
  0xab   : > { %2494 = vmatpush1.bf16.msra.mxu0 %v3967_v59  ;;  %v4068_v59 = vld [vmem:[%s4504_s5 + $0x2d4] ss:$68 sps:$4 sm:$0xff]  }
  0xac   : > { %2495 = vmatprep.subr.bf16.mxu0 %v3975_v60  ;;  %v4063_v60 = vld [vmem:[%s4504_s5 + $0x2c8] ss:$68 sps:$4 sm:$0xff]  }
  0xad   : > { %2580 = vmatpush1.bf16.msra.mxu1 %v3970_v61  ;;  %v4071_v61 = vld [vmem:[%s4504_s5 + $0x354] ss:$68 sps:$4 sm:$0xff]  }
  0xae   : > { %2581 = vmatprep.subr.bf16.mxu1 %v3978_v62  ;;  %v4066_v62 = vld [vmem:[%s4504_s5 + $0x2d0] ss:$68 sps:$4 sm:$0xff]  }
  0xaf   : > { %2496 = vmatpush1.bf16.msra.mxu0 %v3973_v63  ;;  %v4074_v63 = vld [vmem:[%s4504_s5 + $0x35c] ss:$68 sps:$4 sm:$0xff]  }
  0xb0   : > { %2497 = vmatprep.subr.bf16.mxu0 %v3981_v0  ;;  %v4069_v0 = vld [vmem:[%s4504_s5 + $0x350] ss:$68 sps:$4 sm:$0xff]  }
  0xb1   : > { %2582 = vmatpush1.bf16.msra.mxu1 %v3976_v1  ;;  %v4077_v1 = vld [vmem:[%s4504_s5 + $0x3dc] ss:$68 sps:$4 sm:$0xff]  }
  0xb2   : > { %2583 = vmatprep.subr.bf16.mxu1 %v3984_v3  ;;  %v4072_v3 = vld [vmem:[%s4504_s5 + $0x358] ss:$68 sps:$4 sm:$0xff]  }
  0xb3   : > { %2498 = vmatpush1.bf16.msra.mxu0 %v3979_v4  ;;  %v4080_v4 = vld [vmem:[%s4504_s5 + $0x3e4] ss:$68 sps:$4 sm:$0xff]  }
  0xb4   : > { %2499 = vmatprep.subr.bf16.mxu0 %v3987_v5  ;;  %v4075_v5 = vld [vmem:[%s4504_s5 + $0x3d8] ss:$68 sps:$4 sm:$0xff]  }
  0xb5   : > { %2584 = vmatpush1.bf16.msra.mxu1 %v3982_v6  ;;  %v4083_v6 = vld [vmem:[%s4504_s5 + $0x464] ss:$68 sps:$4 sm:$0xff]  }
  0xb6   : > { %2585 = vmatprep.subr.bf16.mxu1 %v3990_v7  ;;  %v4078_v7 = vld [vmem:[%s4504_s5 + $0x3e0] ss:$68 sps:$4 sm:$0xff]  }
  0xb7   : > { %2500 = vmatpush1.bf16.msra.mxu0 %v3985_v8  ;;  %v4086_v8 = vld [vmem:[%s4504_s5 + $0x46c] ss:$68 sps:$4 sm:$0xff]  }
  0xb8   : > { %2501 = vmatprep.subr.bf16.mxu0 %v3993_v10  ;;  %v4081_v10 = vld [vmem:[%s4504_s5 + $0x460] ss:$68 sps:$4 sm:$0xff]  }
  0xb9   : > { %2586 = vmatpush1.bf16.msra.mxu1 %v3988_v11  ;;  %v4089_v11 = vld [vmem:[%s4504_s5 + $0x4ec] ss:$68 sps:$4 sm:$0xff]  }
  0xba   : > { %2587 = vmatprep.subr.bf16.mxu1 %v3996_v12  ;;  %v4084_v12 = vld [vmem:[%s4504_s5 + $0x468] ss:$68 sps:$4 sm:$0xff]  }
  0xbb   : > { %2502 = vmatpush1.bf16.msra.mxu0 %v3991_v13  ;;  %v4092_v13 = vld [vmem:[%s4504_s5 + $0x4f4] ss:$68 sps:$4 sm:$0xff]  }
  0xbc   : > { %2503 = vmatprep.subr.bf16.mxu0 %v3999_v14  ;;  %v4087_v14 = vld [vmem:[%s4504_s5 + $0x4e8] ss:$68 sps:$4 sm:$0xff]  }
  0xbd   : > { %2588 = vmatpush1.bf16.msra.mxu1 %v3994_v15  ;;  %v4095_v15 = vld [vmem:[%s4504_s5 + $0x574] ss:$68 sps:$4 sm:$0xff]  }
  0xbe   : > { %2589 = vmatprep.subr.bf16.mxu1 %v4002_v16  ;;  %v4090_v16 = vld [vmem:[%s4504_s5 + $0x4f0] ss:$68 sps:$4 sm:$0xff]  }
  0xbf   : > { %2504 = vmatpush1.bf16.msra.mxu0 %v3997_v17  ;;  %v4098_v17 = vld [vmem:[%s4504_s5 + $0x57c] ss:$68 sps:$4 sm:$0xff]  }
  0xc0   : > { %2505 = vmatprep.subr.bf16.mxu0 %v4005_v18  ;;  %v4093_v18 = vld [vmem:[%s4504_s5 + $0x570] ss:$68 sps:$4 sm:$0xff]  }
  0xc1   : > { %2590 = vmatpush1.bf16.msra.mxu1 %v4000_v19  ;;  %v4101_v19 = vld [vmem:[%s4504_s5 + $0x5fc] ss:$68 sps:$4 sm:$0xff]  }
  0xc2   : > { %2591 = vmatprep.subr.bf16.mxu1 %v4008_v21  ;;  %v4096_v21 = vld [vmem:[%s4504_s5 + $0x578] ss:$68 sps:$4 sm:$0xff]  }
  0xc3   : > { %2506 = vmatpush1.bf16.msra.mxu0 %v4003_v22  ;;  %v4104_v22 = vld [vmem:[%s4504_s5 + $0x604] ss:$68 sps:$4 sm:$0xff]  }
  0xc4   : > { %2518 = vmatprep.subr.bf16.mxu0 %v4011_v23  ;;  %v4099_v23 = vld [vmem:[%s4504_s5 + $0x5f8] ss:$68 sps:$4 sm:$0xff]  }
  0xc5   : > { %2592 = vmatpush1.bf16.msra.mxu1 %v4006_v24  ;;  %v4107_v24 = vld [vmem:[%s4504_s5 + $0x684] ss:$68 sps:$4 sm:$0xff]  }
  0xc6   : > { %2508 = vmatmul.mubr.bf16.vlgmr.msra.gmra.mrb[4].mxu0 %v4585_v2  ;;  %2604 = vmatprep.subr.bf16.mxu1 %v4014_v25  ;;  %v4102_v25 = vld [vmem:[%s4504_s5 + $0x600] ss:$68 sps:$4 sm:$0xff]  }
  0xc7   : > { %2519 = vmatpush1.bf16.msra.mxu0 %v4009_v26  ;;  %2550 = vmatprep.mubr.bf16.mxu0 %v4381_v9  ;;  %v4110_v26 = vld [vmem:[%s4504_s5 + $0x68c] ss:$68 sps:$4 sm:$0xff]  }
  0xc8   : > { %2594 = vmatmul.mubr.bf16.vlgmr.msra.gmra.mrb[4].mxu1 %v4585_v2  ;;  %2520 = vmatprep.subr.bf16.mxu0 %v4017_v27  ;;  %v4024_v2 = vld [vmem:[%s4504_s5 + $0x9a8] ss:$68 sps:$4 sm:$0xff]   ;;  %v4105_v27 = vld [vmem:[%s4504_s5 + $0x680] ss:$68 sps:$4 sm:$0xff]  }
  0xc9   : > { %2605 = vmatpush1.bf16.msra.mxu1 %v4012_v28  ;;  %2636 = vmatprep.mubr.bf16.mxu1 %v4381_v9  ;;  %v4113_v28 = vld [vmem:[%s4504_s5 + $0x70c] ss:$68 sps:$4 sm:$0xff]  }
  0xca   : > { %2606 = vmatprep.subr.bf16.mxu1 %v4020_v29  ;;  %v4108_v29 = vld [vmem:[%s4504_s5 + $0x688] ss:$68 sps:$4 sm:$0xff]  }
  0xcb   : > { %2521 = vmatpush1.bf16.msra.mxu0 %v4015_v30  ;;  %v4116_v30 = vld [vmem:[%s4504_s5 + $0x714] ss:$68 sps:$4 sm:$0xff]  }
  0xcc   : > { %2522 = vmatprep.subr.bf16.mxu0 %v4023_v31  ;;  %v4111_v31 = vld [vmem:[%s4504_s5 + $0x708] ss:$68 sps:$4 sm:$0xff]  }
  0xcd   : > { %2607 = vmatpush1.bf16.msra.mxu1 %v4018_v32  ;;  %v4119_v32 = vld [vmem:[%s4504_s5 + $0x794] ss:$68 sps:$4 sm:$0xff]  }
  0xce   : > { %2608 = vmatprep.subr.bf16.mxu1 %v4026_v33  ;;  %v4114_v33 = vld [vmem:[%s4504_s5 + $0x710] ss:$68 sps:$4 sm:$0xff]  }
  0xcf   : > { %2523 = vmatpush1.bf16.msra.mxu0 %v4021_v34  ;;  %v4122_v34 = vld [vmem:[%s4504_s5 + $0x79c] ss:$68 sps:$4 sm:$0xff]  }
  0xd0   : > { %2524 = vmatprep.subr.bf16.mxu0 %v4029_v35  ;;  %v4117_v35 = vld [vmem:[%s4504_s5 + $0x790] ss:$68 sps:$4 sm:$0xff]  }
  0xd1   : > { %2609 = vmatpush1.bf16.msra.mxu1 %v4024_v2  ;;  %v4125_v2 = vld [vmem:[%s4504_s5 + $0x81c] ss:$68 sps:$4 sm:$0xff]  }
  0xd2   : > { %2610 = vmatprep.subr.bf16.mxu1 %v4032_v36  ;;  %v4120_v36 = vld [vmem:[%s4504_s5 + $0x798] ss:$68 sps:$4 sm:$0xff]  }
  0xd3   : > { %2525 = vmatpush1.bf16.msra.mxu0 %v4027_v37  ;;  %v4128_v37 = vld [vmem:[%s4504_s5 + $0x824] ss:$68 sps:$4 sm:$0xff]  }
  0xd4   : > { %2647 = vmatprep.subr.bf16.mxu0 %v4035_v38  ;;  %v4123_v38 = vld [vmem:[%s4504_s5 + $0x818] ss:$68 sps:$4 sm:$0xff]  }
  0xd5   : > { %2611 = vmatpush1.bf16.msra.mxu1 %v4030_v39  ;;  %v4131_v39 = vld [vmem:[%s4504_s5 + $0x8a4] ss:$68 sps:$4 sm:$0xff]  }
  0xd6   : > { %3643 = vmatmul.mubr.msk.bf16.vlgmr.msra.gmra.mrb[4].mxu0 %vm2299_vm0, %v4610_v20  ;;  %2733 = vmatprep.subr.bf16.mxu1 %v4038_v40  ;;  %v4126_v40 = vld [vmem:[%s4504_s5 + $0x820] ss:$68 sps:$4 sm:$0xff]  }
  0xd7   : > { %2648 = vmatpush1.bf16.msra.mxu0 %v4033_v41  ;;  %2679 = vmatprep.mubr.bf16.mxu0 %v4560_v47  ;;  %v4134_v41 = vld [vmem:[%s4504_s5 + $0x8ac] ss:$68 sps:$4 sm:$0xff]  }
  0xd8   : > { %3644 = vmatmul.mubr.msk.bf16.vlgmr.msra.gmra.mrb[4].mxu1 %vm2299_vm0, %v4610_v20  ;;  %2649 = vmatprep.subr.bf16.mxu0 %v4041_v42  ;;  %v4048_v20 = vld [vmem:[%s4504_s5 + $0x138] ss:$68 sps:$4 sm:$0xff]   ;;  %v4129_v42 = vld [vmem:[%s4504_s5 + $0x8a0] ss:$68 sps:$4 sm:$0xff]  }
  0xd9   : > { %2734 = vmatpush1.bf16.msra.mxu1 %v4036_v43  ;;  %2765 = vmatprep.mubr.bf16.mxu1 %v4560_v47  ;;  %v4059_v47 = vld [vmem:[%s4504_s5 + $0x244] ss:$68 sps:$4 sm:$0xff]   ;;  %v4137_v43 = vld [vmem:[%s4504_s5 + $0x92c] ss:$68 sps:$4 sm:$0xff]  }
  0xda   : > { %2735 = vmatprep.subr.bf16.mxu1 %v4044_v44  ;;  %v4132_v44 = vld [vmem:[%s4504_s5 + $0x8a8] ss:$68 sps:$4 sm:$0xff]  }
  0xdb   : > { %2650 = vmatpush1.bf16.msra.mxu0 %v4039_v45  ;;  %v4779_v45 = vld [vmem:[%s5055_s0] ss:$12 sps:$4 sm:$0xff]  }
  0xdc   : > { %2651 = vmatprep.subr.bf16.mxu0 %v4047_v46  ;;  %v4140_v46 = vld [vmem:[%s4504_s5 + $0x934] ss:$68 sps:$4 sm:$0xff]  }
  0xdd   : > { %2736 = vmatpush1.bf16.msra.mxu1 %v4042_v48  ;;  %v4135_v48 = vld [vmem:[%s4504_s5 + $0x928] ss:$68 sps:$4 sm:$0xff]  }
  0xde   : > { %2737 = vmatprep.subr.bf16.mxu1 %v4050_v49  ;;  %v4143_v49 = vld [vmem:[%s4504_s5 + $0x9b4] ss:$68 sps:$4 sm:$0xff]  }
  0xdf   : > { %2652 = vmatpush1.bf16.msra.mxu0 %v4045_v50  ;;  %v4138_v50 = vld [vmem:[%s4504_s5 + $0x930] ss:$68 sps:$4 sm:$0xff]  }
  0xe0   : > { %2653 = vmatprep.subr.bf16.mxu0 %v4053_v51  ;;  %v4146_v51 = vld [vmem:[%s4504_s5 + $0x9bc] ss:$68 sps:$4 sm:$0xff]  }
  0xe1   : > { %2738 = vmatpush1.bf16.msra.mxu1 %v4048_v20  ;;  %v4141_v20 = vld [vmem:[%s4504_s5 + $0x9b0] ss:$68 sps:$4 sm:$0xff]  }
  0xe2   : > { %2739 = vmatprep.subr.bf16.mxu1 %v4056_v52  ;;  %v4149_v52 = vld [vmem:[%s4504_s5 + $0xa3c] ss:$68 sps:$4 sm:$0xff]  }
  0xe3   : > { %2654 = vmatpush1.bf16.msra.mxu0 %v4051_v53  ;;  %v4144_v53 = vld [vmem:[%s4504_s5 + $0x9b8] ss:$68 sps:$4 sm:$0xff]  }
  0xe4   : > { %2655 = vmatprep.subr.bf16.mxu0 %v4059_v47  ;;  %v4152_v47 = vld [vmem:[%s4504_s5 + $0xa44] ss:$68 sps:$4 sm:$0xff]  }
  0xe5   : > { %2740 = vmatpush1.bf16.msra.mxu1 %v4054_v54  ;;  %v4147_v54 = vld [vmem:[%s4504_s5 + $0xa38] ss:$68 sps:$4 sm:$0xff]  }
  0xe6   : > { %2741 = vmatprep.subr.bf16.mxu1 %v4062_v55  ;;  %v4155_v55 = vld [vmem:[%s4504_s5 + $0x34] ss:$68 sps:$4 sm:$0xff]  }
  0xe7   : > { %2656 = vmatpush1.bf16.msra.mxu0 %v4057_v56  ;;  %v4150_v56 = vld [vmem:[%s4504_s5 + $0xa40] ss:$68 sps:$4 sm:$0xff]  }
  0xe8   : > { %2657 = vmatprep.subr.bf16.mxu0 %v4065_v57  ;;  %v4158_v57 = vld [vmem:[%s4504_s5 + $0x3c] ss:$68 sps:$4 sm:$0xff]  }
  0xe9   : > { %2742 = vmatpush1.bf16.msra.mxu1 %v4060_v58  ;;  %v4153_v58 = vld [vmem:[%s4504_s5 + $0x30] ss:$68 sps:$4 sm:$0xff]  }
  0xea   : > { %2743 = vmatprep.subr.bf16.mxu1 %v4068_v59  ;;  %v4161_v59 = vld [vmem:[%s4504_s5 + $0xbc] ss:$68 sps:$4 sm:$0xff]  }
  0xeb   : > { %2658 = vmatpush1.bf16.msra.mxu0 %v4063_v60  ;;  %v4156_v60 = vld [vmem:[%s4504_s5 + $0x38] ss:$68 sps:$4 sm:$0xff]  }
  0xec   : > { %2659 = vmatprep.subr.bf16.mxu0 %v4071_v61  ;;  %v4804_v61 = vld [vmem:[%s5055_s0 + $0x8] ss:$12 sps:$4 sm:$0xff]  }
  0xed   : > { %2744 = vmatpush1.bf16.msra.mxu1 %v4066_v62  ;;  %v4164_v62 = vld [vmem:[%s4504_s5 + $0xc4] ss:$68 sps:$4 sm:$0xff]  }
  0xee   : > { %2745 = vmatprep.subr.bf16.mxu1 %v4074_v63  ;;  %v4159_v63 = vld [vmem:[%s4504_s5 + $0xb8] ss:$68 sps:$4 sm:$0xff]  }
  0xef   : > { %2660 = vmatpush1.bf16.msra.mxu0 %v4069_v0  ;;  %v4813_v0 = vld [vmem:[%s5055_s0 + $0x4] ss:$12 sps:$4 sm:$0xff]  }
  0xf0   : > { %2661 = vmatprep.subr.bf16.mxu0 %v4077_v1  ;;  %v4167_v1 = vld [vmem:[%s4504_s5 + $0x144] ss:$68 sps:$4 sm:$0xff]  }
  0xf1   : > { %2746 = vmatpush1.bf16.msra.mxu1 %v4072_v3  ;;  %v4162_v3 = vld [vmem:[%s4504_s5 + $0xc0] ss:$68 sps:$4 sm:$0xff]  }
  0xf2   : > { %2747 = vmatprep.subr.bf16.mxu1 %v4080_v4  ;;  %v4170_v4 = vld [vmem:[%s4504_s5 + $0x14c] ss:$68 sps:$4 sm:$0xff]  }
  0xf3   : > { %2662 = vmatpush1.bf16.msra.mxu0 %v4075_v5  ;;  %v4165_v5 = vld [vmem:[%s4504_s5 + $0x140] ss:$68 sps:$4 sm:$0xff]  }
  0xf4   : > { %2663 = vmatprep.subr.bf16.mxu0 %v4083_v6  ;;  %v4173_v6 = vld [vmem:[%s4504_s5 + $0x1cc] ss:$68 sps:$4 sm:$0xff]  }
  0xf5   : > { %2748 = vmatpush1.bf16.msra.mxu1 %v4078_v7  ;;  %v4168_v7 = vld [vmem:[%s4504_s5 + $0x148] ss:$68 sps:$4 sm:$0xff]  }
  0xf6   : > { %2749 = vmatprep.subr.bf16.mxu1 %v4086_v8  ;;  %v4176_v8 = vld [vmem:[%s4504_s5 + $0x1d4] ss:$68 sps:$4 sm:$0xff]  }
  0xf7   : > { %2664 = vmatpush1.bf16.msra.mxu0 %v4081_v10  ;;  %v4171_v10 = vld [vmem:[%s4504_s5 + $0x1c8] ss:$68 sps:$4 sm:$0xff]  }
  0xf8   : > { %2665 = vmatprep.subr.bf16.mxu0 %v4089_v11  ;;  %v4179_v11 = vld [vmem:[%s4504_s5 + $0x254] ss:$68 sps:$4 sm:$0xff]  }
  0xf9   : > { %2750 = vmatpush1.bf16.msra.mxu1 %v4084_v12  ;;  %v4174_v12 = vld [vmem:[%s4504_s5 + $0x1d0] ss:$68 sps:$4 sm:$0xff]  }
  0xfa   : > { %2751 = vmatprep.subr.bf16.mxu1 %v4092_v13  ;;  %v4182_v13 = vld [vmem:[%s4504_s5 + $0x25c] ss:$68 sps:$4 sm:$0xff]  }
  0xfb   : > { %2666 = vmatpush1.bf16.msra.mxu0 %v4087_v14  ;;  %v4177_v14 = vld [vmem:[%s4504_s5 + $0x250] ss:$68 sps:$4 sm:$0xff]  }
  0xfc   : > { %2667 = vmatprep.subr.bf16.mxu0 %v4095_v15  ;;  %v4185_v15 = vld [vmem:[%s4504_s5 + $0x2dc] ss:$68 sps:$4 sm:$0xff]  }
  0xfd   : > { %2752 = vmatpush1.bf16.msra.mxu1 %v4090_v16  ;;  %v4180_v16 = vld [vmem:[%s4504_s5 + $0x258] ss:$68 sps:$4 sm:$0xff]  }
  0xfe   : > { %2753 = vmatprep.subr.bf16.mxu1 %v4098_v17  ;;  %v4188_v17 = vld [vmem:[%s4504_s5 + $0x2e4] ss:$68 sps:$4 sm:$0xff]  }
  0xff   : > { %2668 = vmatpush1.bf16.msra.mxu0 %v4093_v18  ;;  %v4183_v18 = vld [vmem:[%s4504_s5 + $0x2d8] ss:$68 sps:$4 sm:$0xff]  }
 0x100   : > { %2669 = vmatprep.subr.bf16.mxu0 %v4101_v19  ;;  %v4191_v19 = vld [vmem:[%s4504_s5 + $0x364] ss:$68 sps:$4 sm:$0xff]  }
 0x101   : > { %2754 = vmatpush1.bf16.msra.mxu1 %v4096_v21  ;;  %v4186_v21 = vld [vmem:[%s4504_s5 + $0x2e0] ss:$68 sps:$4 sm:$0xff]  }
 0x102   : > { %2755 = vmatprep.subr.bf16.mxu1 %v4104_v22  ;;  %v4194_v22 = vld [vmem:[%s4504_s5 + $0x36c] ss:$68 sps:$4 sm:$0xff]  }
 0x103   : > { %2670 = vmatpush1.bf16.msra.mxu0 %v4099_v23  ;;  %v4189_v23 = vld [vmem:[%s4504_s5 + $0x360] ss:$68 sps:$4 sm:$0xff]  }
 0x104   : > { %2671 = vmatprep.subr.bf16.mxu0 %v4107_v24  ;;  %v4197_v24 = vld [vmem:[%s4504_s5 + $0x3ec] ss:$68 sps:$4 sm:$0xff]  }
 0x105   : > { %2756 = vmatpush1.bf16.msra.mxu1 %v4102_v25  ;;  %v4192_v25 = vld [vmem:[%s4504_s5 + $0x368] ss:$68 sps:$4 sm:$0xff]  }
 0x106   : > { %2757 = vmatprep.subr.bf16.mxu1 %v4110_v26  ;;  %v4200_v26 = vld [vmem:[%s4504_s5 + $0x3f4] ss:$68 sps:$4 sm:$0xff]  }
 0x107   : > { %2672 = vmatpush1.bf16.msra.mxu0 %v4105_v27  ;;  %v4195_v27 = vld [vmem:[%s4504_s5 + $0x3e8] ss:$68 sps:$4 sm:$0xff]  }
 0x108   : > { %2673 = vmatprep.subr.bf16.mxu0 %v4113_v28  ;;  %v4203_v28 = vld [vmem:[%s4504_s5 + $0x474] ss:$68 sps:$4 sm:$0xff]  }
 0x109   : > { %2758 = vmatpush1.bf16.msra.mxu1 %v4108_v29  ;;  %v4198_v29 = vld [vmem:[%s4504_s5 + $0x3f0] ss:$68 sps:$4 sm:$0xff]  }
 0x10a   : > { %2759 = vmatprep.subr.bf16.mxu1 %v4116_v30  ;;  %v4206_v30 = vld [vmem:[%s4504_s5 + $0x47c] ss:$68 sps:$4 sm:$0xff]  }
 0x10b   : > { %2674 = vmatpush1.bf16.msra.mxu0 %v4111_v31  ;;  %v4201_v31 = vld [vmem:[%s4504_s5 + $0x470] ss:$68 sps:$4 sm:$0xff]  }
 0x10c   : > { %2675 = vmatprep.subr.bf16.mxu0 %v4119_v32  ;;  %v4209_v32 = vld [vmem:[%s4504_s5 + $0x4fc] ss:$68 sps:$4 sm:$0xff]  }
 0x10d   : > { %2760 = vmatpush1.bf16.msra.mxu1 %v4114_v33  ;;  %v4204_v33 = vld [vmem:[%s4504_s5 + $0x478] ss:$68 sps:$4 sm:$0xff]  }
 0x10e   : > { %2761 = vmatprep.subr.bf16.mxu1 %v4122_v34  ;;  %v4212_v34 = vld [vmem:[%s4504_s5 + $0x504] ss:$68 sps:$4 sm:$0xff]  }
 0x10f   : > { %2676 = vmatpush1.bf16.msra.mxu0 %v4117_v35  ;;  %v4207_v35 = vld [vmem:[%s4504_s5 + $0x4f8] ss:$68 sps:$4 sm:$0xff]  }
 0x110   : > { %2677 = vmatprep.subr.bf16.mxu0 %v4125_v2  ;;  %v4215_v2 = vld [vmem:[%s4504_s5 + $0x584] ss:$68 sps:$4 sm:$0xff]  }
 0x111   : > { %2762 = vmatpush1.bf16.msra.mxu1 %v4120_v36  ;;  %v4210_v36 = vld [vmem:[%s4504_s5 + $0x500] ss:$68 sps:$4 sm:$0xff]  }
 0x112   : > { %2763 = vmatprep.subr.bf16.mxu1 %v4128_v37  ;;  %v4218_v37 = vld [vmem:[%s4504_s5 + $0x58c] ss:$68 sps:$4 sm:$0xff]  }
 0x113   : > { %2678 = vmatpush1.bf16.msra.mxu0 %v4123_v38  ;;  %v4213_v38 = vld [vmem:[%s4504_s5 + $0x580] ss:$68 sps:$4 sm:$0xff]  }
 0x114   : > { %2690 = vmatprep.subr.bf16.mxu0 %v4131_v39  ;;  %v4221_v39 = vld [vmem:[%s4504_s5 + $0x60c] ss:$68 sps:$4 sm:$0xff]  }
 0x115   : > { %2764 = vmatpush1.bf16.msra.mxu1 %v4126_v40  ;;  %v4216_v40 = vld [vmem:[%s4504_s5 + $0x588] ss:$68 sps:$4 sm:$0xff]  }
 0x116   : > { %2680 = vmatmul.mubr.bf16.vlgmr.msra.gmra.mrb[8].mxu0 %v4779_v45  ;;  %2776 = vmatprep.subr.bf16.mxu1 %v4134_v41  ;;  %v4224_v41 = vld [vmem:[%s4504_s5 + $0x614] ss:$68 sps:$4 sm:$0xff]  }
 0x117   : > { %2691 = vmatpush1.bf16.msra.mxu0 %v4129_v42  ;;  %2722 = vmatprep.mubr.bf16.mxu0 %v4381_v9  ;;  %v4219_v42 = vld [vmem:[%s4504_s5 + $0x608] ss:$68 sps:$4 sm:$0xff]  }
 0x118   : > { %2766 = vmatmul.mubr.bf16.vlgmr.msra.gmra.mrb[8].mxu1 %v4779_v45  ;;  %2692 = vmatprep.subr.bf16.mxu0 %v4137_v43  ;;  %v4227_v43 = vld [vmem:[%s4504_s5 + $0x694] ss:$68 sps:$4 sm:$0xff]  }
 0x119   : > { %2777 = vmatpush1.bf16.msra.mxu1 %v4132_v44  ;;  %2808 = vmatprep.mubr.bf16.mxu1 %v4381_v9  ;;  %v4222_v44 = vld [vmem:[%s4504_s5 + $0x610] ss:$68 sps:$4 sm:$0xff]  }
 0x11a   : > { %2778 = vmatprep.subr.bf16.mxu1 %v4140_v46  ;;  %v4230_v46 = vld [vmem:[%s4504_s5 + $0x69c] ss:$68 sps:$4 sm:$0xff]  }
 0x11b   : > { %2693 = vmatpush1.bf16.msra.mxu0 %v4135_v48  ;;  %v4225_v48 = vld [vmem:[%s4504_s5 + $0x690] ss:$68 sps:$4 sm:$0xff]  }
 0x11c   : > { %2694 = vmatprep.subr.bf16.mxu0 %v4143_v49  ;;  %v4233_v49 = vld [vmem:[%s4504_s5 + $0x71c] ss:$68 sps:$4 sm:$0xff]  }
 0x11d   : > { %2779 = vmatpush1.bf16.msra.mxu1 %v4138_v50  ;;  %v4228_v50 = vld [vmem:[%s4504_s5 + $0x698] ss:$68 sps:$4 sm:$0xff]  }
 0x11e   : > { %2780 = vmatprep.subr.bf16.mxu1 %v4146_v51  ;;  %v4236_v51 = vld [vmem:[%s4504_s5 + $0x724] ss:$68 sps:$4 sm:$0xff]  }
 0x11f   : > { %2695 = vmatpush1.bf16.msra.mxu0 %v4141_v20  ;;  %v4231_v20 = vld [vmem:[%s4504_s5 + $0x718] ss:$68 sps:$4 sm:$0xff]  }
 0x120   : > { %2696 = vmatprep.subr.bf16.mxu0 %v4149_v52  ;;  %v4239_v52 = vld [vmem:[%s4504_s5 + $0x7a4] ss:$68 sps:$4 sm:$0xff]  }
 0x121   : > { %2781 = vmatpush1.bf16.msra.mxu1 %v4144_v53 }
 0x122   : > { %2782 = vmatprep.subr.bf16.mxu1 %v4152_v47  ;;  %v4234_v47 = vld [vmem:[%s4504_s5 + $0x720] ss:$68 sps:$4 sm:$0xff]  }
 0x123   : > { %2697 = vmatpush1.bf16.msra.mxu0 %v4147_v54 }
 0x124   : > { %2819 = vmatprep.subr.bf16.mxu0 %v4155_v55  ;;  %v4242_v55 = vld [vmem:[%s4504_s5 + $0x7ac] ss:$68 sps:$4 sm:$0xff]  }
 0x125   : > { %2783 = vmatpush1.bf16.msra.mxu1 %v4150_v56 }
 0x126   : > { %3645 = vmatmul.mubr.msk.bf16.vlgmr.msra.gmra.mrb[8].mxu0 %vm2299_vm0, %v4804_v61  ;;  %2905 = vmatprep.subr.bf16.mxu1 %v4158_v57 }
 0x127   : > { %2820 = vmatpush1.bf16.msra.mxu0 %v4153_v58  ;;  %2851 = vmatprep.mubr.bf16.mxu0 %v4813_v0  ;;  %v4237_v58 = vld [vmem:[%s4504_s5 + $0x7a0] ss:$68 sps:$4 sm:$0xff]  }
 0x128   : > { %3646 = vmatmul.mubr.msk.bf16.vlgmr.msra.gmra.mrb[8].mxu1 %vm2299_vm0, %v4804_v61  ;;  %2821 = vmatprep.subr.bf16.mxu0 %v4161_v59 }
 0x129   : > { %2906 = vmatpush1.bf16.msra.mxu1 %v4156_v60  ;;  %2937 = vmatprep.mubr.bf16.mxu1 %v4813_v0 }
 0x12a   : > { %2907 = vmatprep.subr.bf16.mxu1 %v4164_v62  ;;  %v4245_v62 = vld [vmem:[%s4504_s5 + $0x82c] ss:$68 sps:$4 sm:$0xff]  }
 0x12b   : > { %2822 = vmatpush1.bf16.msra.mxu0 %v4159_v63 }
 0x12c   : > { %2823 = vmatprep.subr.bf16.mxu0 %v4167_v1  ;;  %v4240_v1 = vld [vmem:[%s4504_s5 + $0x7a8] ss:$68 sps:$4 sm:$0xff]  }
 0x12d   : > { %2908 = vmatpush1.bf16.msra.mxu1 %v4162_v3 }
 0x12e   : > { %2909 = vmatprep.subr.bf16.mxu1 %v4170_v4  ;;  %v4248_v4 = vld [vmem:[%s4504_s5 + $0x834] ss:$68 sps:$4 sm:$0xff]  }
 0x12f   : > { %2824 = vmatpush1.bf16.msra.mxu0 %v4165_v5  ;;  %v4243_v5 = vld [vmem:[%s4504_s5 + $0x828] ss:$68 sps:$4 sm:$0xff]  }
 0x130   : > { %2825 = vmatprep.subr.bf16.mxu0 %v4173_v6  ;;  %v4251_v6 = vld [vmem:[%s4504_s5 + $0x8b4] ss:$68 sps:$4 sm:$0xff]  }
 0x131   : > { %2910 = vmatpush1.bf16.msra.mxu1 %v4168_v7  ;;  %v4246_v7 = vld [vmem:[%s4504_s5 + $0x830] ss:$68 sps:$4 sm:$0xff]  }
 0x132   : > { %2911 = vmatprep.subr.bf16.mxu1 %v4176_v8  ;;  %v4254_v8 = vld [vmem:[%s4504_s5 + $0x8bc] ss:$68 sps:$4 sm:$0xff]  }
 0x133   : > { %2826 = vmatpush1.bf16.msra.mxu0 %v4171_v10  ;;  %v4249_v10 = vld [vmem:[%s4504_s5 + $0x8b0] ss:$68 sps:$4 sm:$0xff]  }
 0x134   : > { %2827 = vmatprep.subr.bf16.mxu0 %v4179_v11  ;;  %v4257_v11 = vld [vmem:[%s4504_s5 + $0x93c] ss:$68 sps:$4 sm:$0xff]  }
 0x135   : > { %2912 = vmatpush1.bf16.msra.mxu1 %v4174_v12  ;;  %v4252_v12 = vld [vmem:[%s4504_s5 + $0x8b8] ss:$68 sps:$4 sm:$0xff]  }
 0x136   : > { %2913 = vmatprep.subr.bf16.mxu1 %v4182_v13  ;;  %v4260_v13 = vld [vmem:[%s4504_s5 + $0x944] ss:$68 sps:$4 sm:$0xff]  }
 0x137   : > { %2828 = vmatpush1.bf16.msra.mxu0 %v4177_v14  ;;  %v4255_v14 = vld [vmem:[%s4504_s5 + $0x938] ss:$68 sps:$4 sm:$0xff]  }
 0x138   : > { %2829 = vmatprep.subr.bf16.mxu0 %v4185_v15  ;;  %v4263_v15 = vld [vmem:[%s4504_s5 + $0x9c4] ss:$68 sps:$4 sm:$0xff]  }
 0x139   : > { %2914 = vmatpush1.bf16.msra.mxu1 %v4180_v16  ;;  %v4258_v16 = vld [vmem:[%s4504_s5 + $0x940] ss:$68 sps:$4 sm:$0xff]  }
 0x13a   : > { %2915 = vmatprep.subr.bf16.mxu1 %v4188_v17  ;;  %v4266_v17 = vld [vmem:[%s4504_s5 + $0x9cc] ss:$68 sps:$4 sm:$0xff]  }
 0x13b   : > { %2830 = vmatpush1.bf16.msra.mxu0 %v4183_v18  ;;  %v4261_v18 = vld [vmem:[%s4504_s5 + $0x9c0] ss:$68 sps:$4 sm:$0xff]  }
 0x13c   : > { %2831 = vmatprep.subr.bf16.mxu0 %v4191_v19  ;;  %v4269_v19 = vld [vmem:[%s4504_s5 + $0xa4c] ss:$68 sps:$4 sm:$0xff]  }
 0x13d   : > { %2916 = vmatpush1.bf16.msra.mxu1 %v4186_v21  ;;  %v4264_v21 = vld [vmem:[%s4504_s5 + $0x9c8] ss:$68 sps:$4 sm:$0xff]  }
 0x13e   : > { %2917 = vmatprep.subr.bf16.mxu1 %v4194_v22  ;;  %v4272_v22 = vld [vmem:[%s4504_s5 + $0xa54] ss:$68 sps:$4 sm:$0xff]  }
 0x13f   : > { %2832 = vmatpush1.bf16.msra.mxu0 %v4189_v23  ;;  %v4267_v23 = vld [vmem:[%s4504_s5 + $0xa48] ss:$68 sps:$4 sm:$0xff]  }
 0x140   : > { %2833 = vmatprep.subr.bf16.mxu0 %v4197_v24  ;;  %v4273_v24 = vld [vmem:[%s4504_s5 + $0x480] ss:$68 sps:$4 sm:$0xff]  }
 0x141   : > { %2918 = vmatpush1.bf16.msra.mxu1 %v4192_v25  ;;  %v4274_v25 = vld [vmem:[%s4504_s5 + $0x40] ss:$68 sps:$4 sm:$0xff]  }
 0x142   : > { %2919 = vmatprep.subr.bf16.mxu1 %v4200_v26  ;;  %v4275_v26 = vld [vmem:[%s4504_s5 + $0x508] ss:$68 sps:$4 sm:$0xff]  }
 0x143   : > { %2834 = vmatpush1.bf16.msra.mxu0 %v4195_v27  ;;  %v4283_v27 = vld [vmem:[%s4504_s5 + $0x8c0] ss:$68 sps:$4 sm:$0xff]  }
 0x144   : > { %2835 = vmatprep.subr.bf16.mxu0 %v4203_v28  ;;  %v4382_v28 = vmov 0.0  }
 0x145   : > { %2920 = vmatpush1.bf16.msra.mxu1 %v4198_v29  ;;  %v4276_v29 = vld [vmem:[%s4504_s5 + $0xc8] ss:$68 sps:$4 sm:$0xff]  }
 0x146   : > { %2921 = vmatprep.subr.bf16.mxu1 %v4206_v30  ;;  %v4277_v30 = vld [vmem:[%s4504_s5 + $0x590] ss:$68 sps:$4 sm:$0xff]  }
 0x147   : > { %2836 = vmatpush1.bf16.msra.mxu0 %v4201_v31  ;;  %v4286_v31 = vld [vmem:[%s4504_s5 + $0x948] ss:$68 sps:$4 sm:$0xff]  }
 0x148   : > { %2837 = vmatprep.subr.bf16.mxu0 %v4209_v32  ;;  %v4278_v32 = vld [vmem:[%s4504_s5 + $0x150] ss:$68 sps:$4 sm:$0xff]  }
 0x149   : > { %2922 = vmatpush1.bf16.msra.mxu1 %v4204_v33  ;;  %v4279_v33 = vld [vmem:[%s4504_s5 + $0x618] ss:$68 sps:$4 sm:$0xff]  }
 0x14a   : > { %2923 = vmatprep.subr.bf16.mxu1 %v4212_v34  ;;  %v4280_v34 = vld [vmem:[%s4504_s5 + $0x1d8] ss:$68 sps:$4 sm:$0xff]  }
 0x14b   : > { %2838 = vmatpush1.bf16.msra.mxu0 %v4207_v35  ;;  %v4281_v35 = vld [vmem:[%s4504_s5 + $0x6a0] ss:$68 sps:$4 sm:$0xff]  }
 0x14c   : > { %2839 = vmatprep.subr.bf16.mxu0 %v4215_v2  ;;  %v4292_v2 = vld [vmem:[%s4504_s5 + $0xa58] ss:$68 sps:$4 sm:$0xff]  }
 0x14d   : > { %2924 = vmatpush1.bf16.msra.mxu1 %v4210_v36  ;;  %v4282_v36 = vld [vmem:[%s4504_s5 + $0x260] ss:$68 sps:$4 sm:$0xff]  }
 0x14e   : > { %2925 = vmatprep.subr.bf16.mxu1 %v4218_v37  ;;  %v4284_v37 = vld [vmem:[%s4504_s5 + $0x728] ss:$68 sps:$4 sm:$0xff]  }
 0x14f   : > { %2840 = vmatpush1.bf16.msra.mxu0 %v4213_v38  ;;  %v4285_v38 = vld [vmem:[%s4504_s5 + $0x2e8] ss:$68 sps:$4 sm:$0xff]  }
 0x150   : > { %2841 = vmatprep.subr.bf16.mxu0 %v4221_v39  ;;  %v4287_v39 = vld [vmem:[%s4504_s5 + $0x7b0] ss:$68 sps:$4 sm:$0xff]  }
 0x151   : > { %2926 = vmatpush1.bf16.msra.mxu1 %v4216_v40  ;;  %v4288_v40 = vld [vmem:[%s4504_s5 + $0x370] ss:$68 sps:$4 sm:$0xff]  }
 0x152   : > { %2927 = vmatprep.subr.bf16.mxu1 %v4224_v41  ;;  %v4290_v41 = vld [vmem:[%s4504_s5 + $0x838] ss:$68 sps:$4 sm:$0xff]  }
 0x153   : > { %2842 = vmatpush1.bf16.msra.mxu0 %v4219_v42  ;;  %v4291_v42 = vld [vmem:[%s4504_s5 + $0x3f8] ss:$68 sps:$4 sm:$0xff]  }
 0x154   : > { %2843 = vmatprep.subr.bf16.mxu0 %v4227_v43 }
 0x155   : > { %2928 = vmatpush1.bf16.msra.mxu1 %v4222_v44 }
 0x156   : > { %2929 = vmatprep.subr.bf16.mxu1 %v4230_v46 }
 0x157   : > { %2844 = vmatpush1.bf16.msra.mxu0 %v4225_v48 }
 0x158   : > { %2845 = vmatprep.subr.bf16.mxu0 %v4233_v49 }
 0x159   : > { %2930 = vmatpush1.bf16.msra.mxu1 %v4228_v50  ;;  %v2380_v53 = vpop.f32.mrb[0].mxu0 }
 0x15a   : > { %3073 = vst [vmem:[%s4870_s23] sm:$0xff] %v2380_v53  ;;  %v2382_v54 = vpop.f32.mrb[1].mxu0  ;;  %2931 = vmatprep.subr.bf16.mxu1 %v4236_v51 }
 0x15b   : > { %3074 = vst [vmem:[%s4870_s23 + $0x8] sm:$0xff] %v2382_v54  ;;  %v2466_v56 = vpop.f32.mrb[0].mxu1  ;;  %v2384_v57 = vpop.f32.mrb[2].mxu0  ;;  %2846 = vmatpush1.bf16.msra.mxu0 %v4231_v20 }
 0x15c   : > { %3075 = vst [vmem:[%s4870_s23 + $0x10] sm:$0xff] %v2466_v56  ;;  %3090 = vst [vmem:[%s4870_s23 + $0x88] sm:$0xff] %v2384_v57  ;;  %v2468_v59 = vpop.f32.mrb[1].mxu1  ;;  %v2386_v60 = vpop.f32.mrb[3].mxu0  ;;  %2847 = vmatprep.subr.bf16.mxu0 %v4239_v52 }
 0x15d   : > { %3076 = vst [vmem:[%s4870_s23 + $0x18] sm:$0xff] %v2468_v59  ;;  %3091 = vst [vmem:[%s4870_s23 + $0x90] sm:$0xff] %v2386_v60  ;;  %v2470_v63 = vpop.f32.mrb[2].mxu1  ;;  %2932 = vmatpush1.bf16.msra.mxu1 %v4234_v47 }
 0x15e   : > { %3092 = vst [vmem:[%s4870_s23 + $0x98] sm:$0xff] %v2470_v63  ;;  %v2472_v3 = vpop.f32.mrb[3].mxu1  ;;  %2933 = vmatprep.subr.bf16.mxu1 %v4242_v55 }
 0x15f   : > { %3093 = vst [vmem:[%s4870_s23 + $0xa0] sm:$0xff] %v2472_v3  ;;  %2848 = vmatpush1.bf16.msra.mxu0 %v4237_v58 }
 0x160   : > { %2849 = vmatprep.subr.bf16.mxu0 %v4245_v62 }
 0x161   : > { %2934 = vmatpush1.bf16.msra.mxu1 %v4240_v1 }
 0x162   : > { %2935 = vmatprep.subr.bf16.mxu1 %v4248_v4 }
 0x163   : > { %2850 = vmatpush1.bf16.msra.mxu0 %v4243_v5 }
 0x164   : > { %2862 = vmatprep.subr.bf16.mxu0 %v4251_v6 }
 0x165   : > { %2936 = vmatpush1.bf16.msra.mxu1 %v4246_v7 }
 0x166   : > { %2852 = vmatmul.mubr.bf16.vlgmr.msra.gmra.mrb[12].mxu0 %v4779_v45  ;;  %2948 = vmatprep.subr.bf16.mxu1 %v4254_v8 }
 0x167   : > { %2863 = vmatpush1.bf16.msra.mxu0 %v4249_v10  ;;  %2894 = vmatprep.mubr.bf16.mxu0 %v4381_v9 }
 0x168   : > { %2938 = vmatmul.mubr.bf16.vlgmr.msra.gmra.mrb[12].mxu1 %v4779_v45  ;;  %2864 = vmatprep.subr.bf16.mxu0 %v4257_v11 }
 0x169   : > { %2949 = vmatpush1.bf16.msra.mxu1 %v4252_v12  ;;  %2980 = vmatprep.mubr.bf16.mxu1 %v4381_v9  ;;  %v4270_v9 = vld [vmem:[%s4504_s5 + $0xa50] ss:$68 sps:$4 sm:$0xff]  }
 0x16a   : > { %2950 = vmatprep.subr.bf16.mxu1 %v4260_v13 }
 0x16b   : > { %2865 = vmatpush1.bf16.msra.mxu0 %v4255_v14 }
 0x16c   : > { %2866 = vmatprep.subr.bf16.mxu0 %v4263_v15 }
 0x16d   : > { %2951 = vmatpush1.bf16.msra.mxu1 %v4258_v16 }
 0x16e   : > { %2952 = vmatprep.subr.bf16.mxu1 %v4266_v17  ;;  %v3132_v17 = vld [vmem:[%s4870_s23] sm:$0xff] (%p5062_p8) }
 0x16f   : > { %2867 = vmatpush1.bf16.msra.mxu0 %v4261_v18  ;;  %v3134_v18 = vld [vmem:[%s4870_s23 + $0x8] sm:$0xff] (%p5062_p8)  ;;  %3133 = vst [vmem:[%s4973_s26] sm:$0xff] (%p5062_p8), %v3132_v17 }
 0x170   : > { %2868 = vmatprep.subr.bf16.mxu0 %v4269_v19  ;;  %v3136_v19 = vld [vmem:[%s4870_s23 + $0x10] sm:$0xff] (%p5062_p8)  ;;  %3135 = vst [vmem:[%s4973_s26 + $0x8] sm:$0xff] (%p5062_p8), %v3134_v18 }
 0x171   : > { %2953 = vmatpush1.bf16.msra.mxu1 %v4264_v21  ;;  %v3138_v21 = vld [vmem:[%s4870_s23 + $0x18] sm:$0xff] (%p5062_p8)  ;;  %3137 = vst [vmem:[%s4973_s26 + $0x10] sm:$0xff] (%p5062_p8), %v3136_v19 }
 0x172   : > { %2954 = vmatprep.subr.bf16.mxu1 %v4272_v22  ;;  %3139 = vst [vmem:[%s4973_s26 + $0x18] sm:$0xff] (%p5062_p8), %v3138_v21 }
 0x173   : > { %2869 = vmatpush1.bf16.msra.mxu0 %v4267_v23 }
 0x174   : > { %3654 = vmatprep.subr.bf16.mxu0 %v4273_v24 }
 0x175   : > { %2955 = vmatpush1.bf16.msra.mxu1 %v4270_v9 }
 0x176   : > { %3647 = vmatmul.mubr.msk.bf16.vlgmr.msra.gmra.mrb[12].mxu0 %vm2299_vm0, %v4804_v61  ;;  %3681 = vmatprep.subr.bf16.mxu1 %v4382_v28 }
 0x177   : > { %3655 = vmatpush3.bf16.msra.mxu0 %v4274_v25  ;;  %3023 = vmatprep.mubr.bf16.mxu0 %v4813_v0  ;;  %v4289_v0 = vld [vmem:[%s4504_s5 + $0x9d0] ss:$68 sps:$4 sm:$0xff]  }
 0x178   : > { %3648 = vmatmul.mubr.msk.bf16.vlgmr.msra.gmra.mrb[12].mxu1 %vm2299_vm0, %v4804_v61  ;;  %3656 = vmatprep.subr.bf16.mxu0 %v4275_v26 }
 0x179   : > { %3682 = vmatpush3.bf16.msra.mxu1 %v4283_v27  ;;  %3689 = vmatprep.mubr.msk.bf16.mxu1 %vm4383_vm1, %v4382_v28 }
 0x17a   : > { %3683 = vmatprep.subr.bf16.mxu1 %v4382_v28 }
 0x17b   : > { %3657 = vmatpush3.bf16.msra.mxu0 %v4276_v29 }
 0x17c   : > { %3658 = vmatprep.subr.bf16.mxu0 %v4277_v30 }
 0x17d   : > { %3684 = vmatpush3.bf16.msra.mxu1 %v4286_v31 }
 0x17e   : > { %3685 = vmatprep.subr.bf16.mxu1 %v4382_v28 }
 0x17f   : > { %3659 = vmatpush3.bf16.msra.mxu0 %v4278_v32 }
 0x180   : > { %3660 = vmatprep.subr.bf16.mxu0 %v4279_v33 }
 0x181   : > { %3686 = vmatpush3.bf16.msra.mxu1 %v4289_v0  ;;  %v3166_v0 = vld [vmem:[%s4870_s23 + $0x88] sm:$0xff] (%p5062_p8) }
 0x182   : > { %3687 = vmatprep.subr.bf16.mxu1 %v4382_v28  ;;  %3167 = vst [vmem:[%s4973_s26 + $0x110] sm:$0xff] (%p5062_p8), %v3166_v0 }
 0x183   : > { %3661 = vmatpush3.bf16.msra.mxu0 %v4280_v34  ;;  %v3168_v34 = vld [vmem:[%s4870_s23 + $0x90] sm:$0xff] (%p5062_p8) }
 0x184   : > { %3662 = vmatprep.subr.bf16.mxu0 %v4281_v35  ;;  %v3170_v35 = vld [vmem:[%s4870_s23 + $0x98] sm:$0xff] (%p5062_p8)  ;;  %3169 = vst [vmem:[%s4973_s26 + $0x118] sm:$0xff] (%p5062_p8), %v3168_v34 }
 0x185   : > { %3688 = vmatpush3.bf16.msra.mxu1 %v4292_v2  ;;  %v3172_v2 = vld [vmem:[%s4870_s23 + $0xa0] sm:$0xff] (%p5062_p8)  ;;  %3171 = vst [vmem:[%s4973_s26 + $0x120] sm:$0xff] (%p5062_p8), %v3170_v35 }
 0x186   : > { %3173 = vst [vmem:[%s4973_s26 + $0x128] sm:$0xff] (%p5062_p8), %v3172_v2 }
 0x187   : > { %3663 = vmatpush3.bf16.msra.mxu0 %v4282_v36 }
 0x188   : > { %3664 = vmatprep.subr.bf16.mxu0 %v4284_v37  ;;  %3690 = vmatmul.mubr.msk.bf16.vlgmr.msra.gmra.mrb[16].mxu1 %vm2299_vm0, %v4804_v61 }
 0x18b   : > { %3665 = vmatpush3.bf16.msra.mxu0 %v4285_v38 }
 0x18c   : > { %3666 = vmatprep.subr.bf16.mxu0 %v4287_v39 }
 0x18f   : > { %3667 = vmatpush3.bf16.msra.mxu0 %v4288_v40 }
 0x190   : > { %3668 = vmatprep.subr.bf16.mxu0 %v4290_v41 }
 0x193   : > { %3669 = vmatpush3.bf16.msra.mxu0 %v4291_v42 }
 0x196   : > { %3024 = vmatmul.mubr.bf16.vlgmr.msra.gmra.mrb[16].mxu0 %v4779_v45 }
 0x1a9   : > { %v2552_v43 = vpop.f32.mrb[4].mxu0 }
 0x1aa   : > { %3077 = vst [vmem:[%s4870_s23 + $0x20] sm:$0xff] %v2552_v43  ;;  %v2554_v61 = vpop.f32.mrb[5].mxu0 }
 0x1ab   : > { %3078 = vst [vmem:[%s4870_s23 + $0x28] sm:$0xff] %v2554_v61  ;;  %v2638_v44 = vpop.f32.mrb[4].mxu1  ;;  %v2556_v46 = vpop.f32.mrb[6].mxu0 }
 0x1ac   : > { %3079 = vst [vmem:[%s4870_s23 + $0x30] sm:$0xff] %v2638_v44  ;;  %3094 = vst [vmem:[%s4870_s23 + $0xa8] sm:$0xff] %v2556_v46  ;;  %v2640_v48 = vpop.f32.mrb[5].mxu1  ;;  %v2558_v49 = vpop.f32.mrb[7].mxu0 }
 0x1ad   : > { %3080 = vst [vmem:[%s4870_s23 + $0x38] sm:$0xff] %v2640_v48  ;;  %3095 = vst [vmem:[%s4870_s23 + $0xb0] sm:$0xff] %v2558_v49  ;;  %v2642_v45 = vpop.f32.mrb[6].mxu1 }
 0x1ae   : > { %3096 = vst [vmem:[%s4870_s23 + $0xb8] sm:$0xff] %v2642_v45  ;;  %v2644_v50 = vpop.f32.mrb[7].mxu1 }
 0x1af   : > { %3097 = vst [vmem:[%s4870_s23 + $0xc0] sm:$0xff] %v2644_v50 }
 0x1b1   : > { %v3140_v22 = vld [vmem:[%s4870_s23 + $0x20] sm:$0xff] (%p5062_p8) }
 0x1b2   : > { %v3142_v23 = vld [vmem:[%s4870_s23 + $0x28] sm:$0xff] (%p5062_p8)  ;;  %3141 = vst [vmem:[%s4973_s26 + $0x20] sm:$0xff] (%p5062_p8), %v3140_v22 }
 0x1b3   : > { %v3144_v24 = vld [vmem:[%s4870_s23 + $0x30] sm:$0xff] (%p5062_p8)  ;;  %3143 = vst [vmem:[%s4973_s26 + $0x28] sm:$0xff] (%p5062_p8), %v3142_v23  ;;  %v3174_v36 = vld [vmem:[%s4870_s23 + $0xa8] sm:$0xff] (%p5062_p8) }
 0x1b4   : > { %v3146_v9 = vld [vmem:[%s4870_s23 + $0x38] sm:$0xff] (%p5062_p8)  ;;  %3145 = vst [vmem:[%s4973_s26 + $0x30] sm:$0xff] (%p5062_p8), %v3144_v24  ;;  %v3176_v37 = vld [vmem:[%s4870_s23 + $0xb0] sm:$0xff] (%p5062_p8)  ;;  %3175 = vst [vmem:[%s4973_s26 + $0x130] sm:$0xff] (%p5062_p8), %v3174_v36 }
 0x1b5   : > { %3147 = vst [vmem:[%s4973_s26 + $0x38] sm:$0xff] (%p5062_p8), %v3146_v9  ;;  %v3178_v38 = vld [vmem:[%s4870_s23 + $0xb8] sm:$0xff] (%p5062_p8)  ;;  %3177 = vst [vmem:[%s4973_s26 + $0x138] sm:$0xff] (%p5062_p8), %v3176_v37 }
 0x1b6   : > { %3179 = vst [vmem:[%s4973_s26 + $0x140] sm:$0xff] (%p5062_p8), %v3178_v38  ;;  %v3180_v39 = vld [vmem:[%s4870_s23 + $0xc0] sm:$0xff] (%p5062_p8) }
 0x1b7   : > { %3181 = vst [vmem:[%s4973_s26 + $0x148] sm:$0xff] (%p5062_p8), %v3180_v39 }
 0x1f9   : > { %v2724_v51 = vpop.f32.mrb[8].mxu0 }
 0x1fa   : > { %3081 = vst [vmem:[%s4870_s23 + $0x40] sm:$0xff] %v2724_v51  ;;  %v2726_v20 = vpop.f32.mrb[9].mxu0 }
 0x1fb   : > { %3082 = vst [vmem:[%s4870_s23 + $0x48] sm:$0xff] %v2726_v20  ;;  %v2810_v52 = vpop.f32.mrb[8].mxu1  ;;  %v2728_v53 = vpop.f32.mrb[10].mxu0 }
 0x1fc   : > { %3083 = vst [vmem:[%s4870_s23 + $0x50] sm:$0xff] %v2810_v52  ;;  %3098 = vst [vmem:[%s4870_s23 + $0xc8] sm:$0xff] %v2728_v53  ;;  %v2812_v47 = vpop.f32.mrb[9].mxu1  ;;  %v2730_v54 = vpop.f32.mrb[11].mxu0 }
 0x1fd   : > { %3084 = vst [vmem:[%s4870_s23 + $0x58] sm:$0xff] %v2812_v47  ;;  %3099 = vst [vmem:[%s4870_s23 + $0xd0] sm:$0xff] %v2730_v54  ;;  %v2814_v55 = vpop.f32.mrb[10].mxu1 }
 0x1fe   : > { %3100 = vst [vmem:[%s4870_s23 + $0xd8] sm:$0xff] %v2814_v55  ;;  %v2816_v56 = vpop.f32.mrb[11].mxu1 }
 0x1ff   : > { %3101 = vst [vmem:[%s4870_s23 + $0xe0] sm:$0xff] %v2816_v56 }
 0x201   : > { %v3148_v25 = vld [vmem:[%s4870_s23 + $0x40] sm:$0xff] (%p5062_p8) }
 0x202   : > { %3149 = vst [vmem:[%s4973_s26 + $0x40] sm:$0xff] (%p5062_p8), %v3148_v25  ;;  %v3150_v26 = vld [vmem:[%s4870_s23 + $0x48] sm:$0xff] (%p5062_p8) }
 0x203   : > { %v3152_v27 = vld [vmem:[%s4870_s23 + $0x50] sm:$0xff] (%p5062_p8)  ;;  %3151 = vst [vmem:[%s4973_s26 + $0x48] sm:$0xff] (%p5062_p8), %v3150_v26  ;;  %v3182_v40 = vld [vmem:[%s4870_s23 + $0xc8] sm:$0xff] (%p5062_p8) }
 0x204   : > { %v3154_v28 = vld [vmem:[%s4870_s23 + $0x58] sm:$0xff] (%p5062_p8)  ;;  %3153 = vst [vmem:[%s4973_s26 + $0x50] sm:$0xff] (%p5062_p8), %v3152_v27  ;;  %v3184_v41 = vld [vmem:[%s4870_s23 + $0xd0] sm:$0xff] (%p5062_p8)  ;;  %3183 = vst [vmem:[%s4973_s26 + $0x150] sm:$0xff] (%p5062_p8), %v3182_v40 }
 0x205   : > { %3155 = vst [vmem:[%s4973_s26 + $0x58] sm:$0xff] (%p5062_p8), %v3154_v28  ;;  %3185 = vst [vmem:[%s4973_s26 + $0x158] sm:$0xff] (%p5062_p8), %v3184_v41  ;;  %v3186_v42 = vld [vmem:[%s4870_s23 + $0xd8] sm:$0xff] (%p5062_p8) }
 0x206   : > { %v3188_v43 = vld [vmem:[%s4870_s23 + $0xe0] sm:$0xff] (%p5062_p8)  ;;  %3187 = vst [vmem:[%s4973_s26 + $0x160] sm:$0xff] (%p5062_p8), %v3186_v42 }
 0x207   : > { %3189 = vst [vmem:[%s4973_s26 + $0x168] sm:$0xff] (%p5062_p8), %v3188_v43 }
 0x249   : > { %v2896_v57 = vpop.f32.mrb[12].mxu0 }
 0x24a   : > { %3085 = vst [vmem:[%s4870_s23 + $0x60] sm:$0xff] %v2896_v57  ;;  %v2898_v58 = vpop.f32.mrb[13].mxu0 }
 0x24b   : > { %3086 = vst [vmem:[%s4870_s23 + $0x68] sm:$0xff] %v2898_v58  ;;  %v2982_v59 = vpop.f32.mrb[12].mxu1  ;;  %v2900_v60 = vpop.f32.mrb[14].mxu0 }
 0x24c   : > { %3087 = vst [vmem:[%s4870_s23 + $0x70] sm:$0xff] %v2982_v59  ;;  %3102 = vst [vmem:[%s4870_s23 + $0xe8] sm:$0xff] %v2900_v60  ;;  %v2984_v62 = vpop.f32.mrb[13].mxu1  ;;  %v2902_v63 = vpop.f32.mrb[15].mxu0 }
 0x24d   : > { %3088 = vst [vmem:[%s4870_s23 + $0x78] sm:$0xff] %v2984_v62  ;;  %3103 = vst [vmem:[%s4870_s23 + $0xf0] sm:$0xff] %v2902_v63  ;;  %v2986_v1 = vpop.f32.mrb[14].mxu1 }
 0x24e   : > { %3104 = vst [vmem:[%s4870_s23 + $0xf8] sm:$0xff] %v2986_v1  ;;  %v2988_v3 = vpop.f32.mrb[15].mxu1 }
 0x24f   : > { %3105 = vst [vmem:[%s4870_s23 + $0x100] sm:$0xff] %v2988_v3 }
 0x251   : > { %v3156_v29 = vld [vmem:[%s4870_s23 + $0x60] sm:$0xff] (%p5062_p8) }
 0x252   : > { %v3158_v30 = vld [vmem:[%s4870_s23 + $0x68] sm:$0xff] (%p5062_p8)  ;;  %3157 = vst [vmem:[%s4973_s26 + $0x60] sm:$0xff] (%p5062_p8), %v3156_v29 }
 0x253   : > { %v3160_v31 = vld [vmem:[%s4870_s23 + $0x70] sm:$0xff] (%p5062_p8)  ;;  %3159 = vst [vmem:[%s4973_s26 + $0x68] sm:$0xff] (%p5062_p8), %v3158_v30  ;;  %v3190_v61 = vld [vmem:[%s4870_s23 + $0xe8] sm:$0xff] (%p5062_p8) }
 0x254   : > { %3161 = vst [vmem:[%s4973_s26 + $0x70] sm:$0xff] (%p5062_p8), %v3160_v31  ;;  %v3162_v32 = vld [vmem:[%s4870_s23 + $0x78] sm:$0xff] (%p5062_p8)  ;;  %3191 = vst [vmem:[%s4973_s26 + $0x170] sm:$0xff] (%p5062_p8), %v3190_v61  ;;  %v3192_v44 = vld [vmem:[%s4870_s23 + $0xf0] sm:$0xff] (%p5062_p8) }
 0x255   : > { %3163 = vst [vmem:[%s4973_s26 + $0x78] sm:$0xff] (%p5062_p8), %v3162_v32  ;;  %v3194_v46 = vld [vmem:[%s4870_s23 + $0xf8] sm:$0xff] (%p5062_p8)  ;;  %3193 = vst [vmem:[%s4973_s26 + $0x178] sm:$0xff] (%p5062_p8), %v3192_v44 }
 0x256   : > { %v3196_v48 = vld [vmem:[%s4870_s23 + $0x100] sm:$0xff] (%p5062_p8)  ;;  %3195 = vst [vmem:[%s4973_s26 + $0x180] sm:$0xff] (%p5062_p8), %v3194_v46 }
 0x257   : > { %3197 = vst [vmem:[%s4973_s26 + $0x188] sm:$0xff] (%p5062_p8), %v3196_v48 }
 0x25b   : > { %v3066_v4 = vpop.f32.mrb[16].mxu1 }
 0x25c   : > { %v3691_v5 = vpop.f32.mrb[17].mxu1 }
 0x25d   : > { %v3069_v6 = vpop.f32.mrb[18].mxu1 }
 0x25e   : > { %v3692_v7 = vpop.f32.mrb[19].mxu1 }
 0x269   : > { %v3670_v8 = vpop.f32.mrb[16].mxu0 }
 0x26a   : > { %v3671_v10 = vpop.f32.mrb[17].mxu0 }
 0x26b   : > { %v3672_v11 = vadd.f32 %v3671_v10, %v3670_v8  ;;  %v3673_v12 = vpop.f32.mrb[18].mxu0  ;;  %3113 = sbr.rel (!%p5062_p8) target bundleno = 634 (0x27a), region = 36 }
 0x26c   : > { %v3674_v13 = vpop.f32.mrb[19].mxu0 }
 0x26d   : > { %v3067_v14 = vadd.f32 %v3672_v11, %v3066_v4  ;;  %v3675_v15 = vadd.f32 %v3674_v13, %v3673_v12 }
 0x26f   : > { %3089 = vst [vmem:[%s4870_s23 + $0x80] sm:$0xff] %v3067_v14  ;;  %v3070_v16 = vadd.f32 %v3675_v15, %v3069_v6 }
 0x271   : > { %3106 = vst [vmem:[%s4870_s23 + $0x108] sm:$0xff] %v3070_v16 }
 0x276   : > { %v3164_v33 = vld [vmem:[%s4870_s23 + $0x80] sm:$0xff] }
 0x277   : > { %3165 = vst [vmem:[%s4973_s26 + $0x80] sm:$0xff] %v3164_v33 }
 0x278   : > { %v3198_v49 = vld [vmem:[%s4870_s23 + $0x108] sm:$0xff] }
 0x279   : > { %3199 = vst [vmem:[%s4973_s26 + $0x190] sm:$0xff] %v3198_v49 }
 0x27a PF: > { %s15_s14 = sadd.s32 1, %s4376_s14   ;;  %s5063_s9 = smov %s4360_s10 }
 0x27b   : > { %p12_p9 = scmp.ge.s32.totalorder %s15_s14, 4   ;;  %s5064_s10 = smov %s4364_s11 }
 0x27c   : > { %s5065_s11 = smov %s4447_s21  ;;  %s5066_s12 = smov %s4372_s13 }
 0x27d   : > { %s5067_s13 = smov %s5069_s16  ;;  %14 = sbr.rel (!%p12_p9) target bundleno = 4 (0x4), region = 94 }
 0x284   :  { %3215 = vsyncpa [#allocation3], 1 }
 0x285   :  { %3217 = vsyncpa [#allocation3 + $0x1], 1 }

</bundles_post_ra>
